<compile_context>
chip_gen: v6e
topology: v6e:2x2x1
jax: 0.10.0
libtpu: 0.0.40
codegen_flags: <defaults>
</compile_context>

<pallas_src>
import jax
import jax.numpy as jnp
import numpy as np
from jax.experimental import pallas as pl
from jax.experimental.pallas import tpu as pltpu

LN_EPS = 1e-5


def lens_probe_kernel(h_ref, wp_ref, bp_ref, g_ref, beta_ref, wlm_ref, fp_ref,
                      logits_ref, kl_ref,
                      normed_sc, m_sc, s_sc, d_sc):
    v = pl.program_id(2)
    num_v = pl.num_programs(2)

    @pl.when(v == 0)
    def _():
        # Probe nn.Linear(D, D): bf16 MXU operands, f32 accumulation.
        proj = jnp.dot(h_ref[...], wp_ref[...],
                       preferred_element_type=jnp.float32) + bp_ref[...]
        # nn.LayerNorm(D), f32 math.
        mean = jnp.mean(proj, axis=-1, keepdims=True)
        var = jnp.mean(jnp.square(proj - mean), axis=-1, keepdims=True)
        normed = (proj - mean) * jax.lax.rsqrt(var + LN_EPS)
        normed = normed * g_ref[...] + beta_ref[...]
        # Persist across the V grid axis (reused by every vocab tile).
        normed_sc[...] = normed.astype(jnp.bfloat16)
        # Reset online-logsumexp / cross-term accumulators.
        m_sc[...] = jnp.full(m_sc.shape, -jnp.inf, m_sc.dtype)
        s_sc[...] = jnp.zeros(s_sc.shape, s_sc.dtype)
        d_sc[...] = jnp.zeros(d_sc.shape, d_sc.dtype)

    # lm_head vocab tile: (tT, D) @ (D, tV), bf16 MXU, f32 accumulation.
    logits = jnp.dot(normed_sc[...], wlm_ref[...],
                     preferred_element_type=jnp.float32)
    logits_ref[...] = logits.astype(logits_ref.dtype)

    # Online logsumexp over the (tiled) vocab axis.
    tile_max = jnp.max(logits, axis=-1, keepdims=True)
    m_new = jnp.maximum(m_sc[...], tile_max)
    s_sc[...] = s_sc[...] * jnp.exp(m_sc[...] - m_new) + \
        jnp.sum(jnp.exp(logits - m_new), axis=-1, keepdims=True)
    m_sc[...] = m_new
    # Running cross term:  sum_v f_probs * logits.
    d_sc[...] = d_sc[...] + jnp.sum(fp_ref[...] * logits, axis=-1, keepdims=True)

    @pl.when(v == num_v - 1)
    def _():
        # Partial per-token KL:  logsumexp_v(logits) - sum_v f_probs*logits.
        # (The layer-independent  sum_v f*log f  term is added in the wrapper.)
        kl_col = m_sc[...] + jnp.log(s_sc[...]) - d_sc[...]        # (tT, 1)
        # Lane-broadcast so the store is a full unmasked vst.
        kl_ref[...] = jnp.broadcast_to(kl_col, kl_ref.shape)


def lens_probing_forward(hidden, wp, bp, gamma, beta, wlm, final_logits,
                         batch_size, *, tile_t=128, tile_v=256):
    """hidden: (L, T, D); wp: (L, D, D); bp/gamma/beta: (L, 1, D);
       wlm: (D, V); final_logits: (T, V); T = batch*seq, flattened row-major."""
    L, T, D = hidden.shape
    V = wlm.shape[1]
    tile_t = min(tile_t, T)
    tile_v = min(tile_v, V)
    assert T % tile_t == 0 and V % tile_v == 0
    n_t, n_v = T // tile_t, V // tile_v

    # Target distribution: hoisted out of the per-layer loop (computed once).
    f_logprobs = jax.nn.log_softmax(final_logits.astype(jnp.float32), axis=-1)
    f_probs = jnp.exp(f_logprobs)
    neg_entropy = jnp.sum(f_probs * f_logprobs)   # scalar: sum_t sum_v f*log f

    # bf16 MXU operands: halves HBM reads of hidden / probe / lm_head weights.
    hidden16 = hidden.astype(jnp.bfloat16)
    wp16 = wp.astype(jnp.bfloat16)
    wlm16 = wlm.astype(jnp.bfloat16)

    probe_logits, kl_lanes = pl.pallas_call(
        lens_probe_kernel,
        out_shape=(
            jax.ShapeDtypeStruct((L, T, V), jnp.bfloat16),    # all_probe_logits
            jax.ShapeDtypeStruct((L, T, 128), jnp.float32),   # KL partial (lane-bcast)
        ),
        grid_spec=pltpu.PrefetchScalarGridSpec(
            num_scalar_prefetch=0,
            grid=(L, n_t, n_v),                               # vocab axis innermost
            in_specs=[
                pl.BlockSpec((None, tile_t, D), lambda l, t, v: (l, t, 0)),  # hidden[l]
                pl.BlockSpec((None, D, D),      lambda l, t, v: (l, 0, 0)),  # probe W
                pl.BlockSpec((None, 1, D),      lambda l, t, v: (l, 0, 0)),  # probe b
                pl.BlockSpec((None, 1, D),      lambda l, t, v: (l, 0, 0)),  # LN gamma
                pl.BlockSpec((None, 1, D),      lambda l, t, v: (l, 0, 0)),  # LN beta
                pl.BlockSpec((D, tile_v),       lambda l, t, v: (0, v)),     # lm_head tile
                pl.BlockSpec((tile_t, tile_v),  lambda l, t, v: (t, v)),     # f_probs tile
            ],
            out_specs=[
                pl.BlockSpec((None, tile_t, tile_v), lambda l, t, v: (l, t, v)),
                pl.BlockSpec((None, tile_t, 128),    lambda l, t, v: (l, t, 0)),
            ],
            scratch_shapes=[
                pltpu.VMEM((tile_t, D), jnp.bfloat16),   # normed (persists across V)
                pltpu.VMEM((tile_t, 1), jnp.float32),    # running max
                pltpu.VMEM((tile_t, 1), jnp.float32),    # running sum-exp
                pltpu.VMEM((tile_t, 1), jnp.float32),    # running sum f*logits
            ],
        ),
        compiler_params=pltpu.CompilerParams(
            dimension_semantics=("parallel", "parallel", "arbitrary")),
    )(hidden16, wp16, bp, gamma, beta, wlm16, f_probs)

    kl_partial = kl_lanes[:, :, 0]                       # (L, T)
    # F.kl_div(reduction='batchmean') divides by input.size(0); the module passes
    # 3-D (B, S, V) log-probs, so the denominator is the batch size B.
    total_probe_loss = (jnp.sum(kl_partial) + L * neg_entropy) / batch_size
    return total_probe_loss, probe_logits


def reference(hidden, wp, bp, gamma, beta, wlm, final_logits, batch_size):
    """Pure-JAX reference mirroring the module semantics (and the kernel's
    bf16-operand / f32-accumulate matmul precision)."""
    f_logprobs = jax.nn.log_softmax(final_logits, axis=-1)
    f_probs = jnp.exp(f_logprobs)
    h16, wp16, wlm16 = (x.astype(jnp.bfloat16) for x in (hidden, wp, wlm))
    total = 0.0
    logits_all = []
    for l in range(hidden.shape[0]):
        proj = jnp.dot(h16[l], wp16[l], preferred_element_type=jnp.float32) + bp[l]
        mean = proj.mean(-1, keepdims=True)
        var = jnp.square(proj - mean).mean(-1, keepdims=True)
        normed = (proj - mean) * jax.lax.rsqrt(var + LN_EPS) * gamma[l] + beta[l]
        logits = jnp.dot(normed.astype(jnp.bfloat16), wlm16,
                         preferred_element_type=jnp.float32)
        logits_all.append(logits.astype(jnp.bfloat16))
        p_logprobs = jax.nn.log_softmax(logits, axis=-1)
        total = total + jnp.sum(f_probs * (f_logprobs - p_logprobs)) / batch_size
    return total, jnp.stack(logits_all)


if __name__ == "__main__":
    # Small, module-consistent shapes: batch=2, seq=64, d_model=128, vocab=512,
    # 3 probing layers.  (Real GPT-2: D=768, V~50k -> same kernel, bigger grid.)
    B, S, D, V, L = 2, 64, 128, 512, 3
    T = B * S

    key = jax.random.PRNGKey(0)
    k_h, k_fl, k_wp, k_bp, k_g, k_be, k_wlm = jax.random.split(key, 7)

    # Synthetic "base model" outputs (stand-ins for hidden_states / logits).
    hidden = jax.random.normal(k_h, (L, T, D), dtype=jnp.float32)
    final_logits = jax.random.normal(k_fl, (T, V), dtype=jnp.float32)

    # Probe parameters: nn.Linear(D, D, bias=True) per probing layer.
    wp = 0.1 * jax.random.normal(k_wp, (L, D, D), dtype=jnp.float32)
    bp = 0.1 * jax.random.normal(k_bp, (L, 1, D), dtype=jnp.float32)
    # nn.LayerNorm default init is gamma=1, beta=0; perturb to exercise the affine path.
    gamma = 1.0 + 0.1 * jax.random.normal(k_g, (L, 1, D), dtype=jnp.float32)
    beta = 0.1 * jax.random.normal(k_be, (L, 1, D), dtype=jnp.float32)
    # lm_head: Linear(D, V, bias=False), shared across probes.
    wlm = 0.1 * jax.random.normal(k_wlm, (D, V), dtype=jnp.float32)

    total_loss, probe_logits = lens_probing_forward(
        hidden, wp, bp, gamma, beta, wlm, final_logits, batch_size=B)
    total_loss = jax.block_until_ready(total_loss)
    probe_logits = jax.block_until_ready(probe_logits)

    ref_loss, ref_logits = reference(
        hidden, wp, bp, gamma, beta, wlm, final_logits, batch_size=B)

    np.testing.assert_allclose(
        np.asarray(probe_logits.astype(jnp.float32)),
        np.asarray(ref_logits.astype(jnp.float32)),
        rtol=2e-2, atol=2e-2)
    np.testing.assert_allclose(
        np.asarray(total_loss), np.asarray(ref_loss), rtol=2e-3, atol=1e-2)

    print("KERNEL_OK")
</pallas_src>

<mosaic_0001>
module attributes {stable_mosaic.version = 11 : i64} {
  func.func @lens_probe_kernel(%arg0: i32, %arg1: i32, %arg2: i32, %arg3: memref<1x128x128xbf16, #tpu.memory_space<vmem>>, %arg4: memref<1x128x128xbf16, #tpu.memory_space<vmem>>, %arg5: memref<1x1x128xf32, #tpu.memory_space<vmem>>, %arg6: memref<1x1x128xf32, #tpu.memory_space<vmem>>, %arg7: memref<1x1x128xf32, #tpu.memory_space<vmem>>, %arg8: memref<128x256xbf16, #tpu.memory_space<vmem>>, %arg9: memref<128x256xf32, #tpu.memory_space<vmem>>, %arg10: memref<1x128x256xbf16, #tpu.memory_space<vmem>>, %arg11: memref<1x128x128xf32, #tpu.memory_space<vmem>>, %arg12: memref<128x128xbf16, #tpu.memory_space<vmem>>, %arg13: memref<128x1xf32, #tpu.memory_space<vmem>>, %arg14: memref<128x1xf32, #tpu.memory_space<vmem>>, %arg15: memref<128x1xf32, #tpu.memory_space<vmem>>) attributes {dimension_semantics = [#tpu.dimension_semantics<parallel>, #tpu.dimension_semantics<parallel>, #tpu.dimension_semantics<arbitrary>], iteration_bounds = array<i64: 3, 1, 2>, scalar_prefetch = 0 : i64, scratch_operands = 4 : i64, tpu.core_type = #tpu.core_type<tc>, window_params = [{transform_indices = @transform_0, window_bounds = array<i64: 1, 128, 128>}, {transform_indices = @transform_1, window_bounds = array<i64: 1, 128, 128>}, {transform_indices = @transform_2, window_bounds = array<i64: 1, 1, 128>}, {transform_indices = @transform_3, window_bounds = array<i64: 1, 1, 128>}, {transform_indices = @transform_4, window_bounds = array<i64: 1, 1, 128>}, {transform_indices = @transform_5, window_bounds = array<i64: 128, 256>}, {transform_indices = @transform_6, window_bounds = array<i64: 128, 256>}, {transform_indices = @transform_7, window_bounds = array<i64: 1, 128, 256>}, {transform_indices = @transform_8, window_bounds = array<i64: 1, 128, 128>}]} {
    %c0_i32 = arith.constant 0 : i32
    %0 = arith.cmpi eq, %arg2, %c0_i32 : i32
    %1 = arith.extui %0 : i1 to i32
    %c0_i32_0 = arith.constant 0 : i32
    %2 = arith.cmpi ne, %1, %c0_i32_0 : i32
    scf.if %2 {
      %c0_27 = arith.constant 0 : index
      %c0_28 = arith.constant 0 : index
      %c0_29 = arith.constant 0 : index
      %37 = vector.load %arg3[%c0_27, %c0_28, %c0_29] : memref<1x128x128xbf16, #tpu.memory_space<vmem>>, vector<1x128x128xbf16>
      %38 = vector.shape_cast %37 : vector<1x128x128xbf16> to vector<128x128xbf16>
      %c0_30 = arith.constant 0 : index
      %c0_31 = arith.constant 0 : index
      %c0_32 = arith.constant 0 : index
      %39 = vector.load %arg4[%c0_30, %c0_31, %c0_32] : memref<1x128x128xbf16, #tpu.memory_space<vmem>>, vector<1x128x128xbf16>
      %40 = vector.shape_cast %39 : vector<1x128x128xbf16> to vector<128x128xbf16>
      %cst_33 = arith.constant dense<0.000000e+00> : vector<128x128xf32>
      %41 = tpu.matmul %38, %40, %cst_33 {dimension_numbers = #tpu.dot_dimension_numbers<[1], [0], [0], [1], [0, 0, 1, 1], [], []>} : vector<128x128xbf16>, vector<128x128xbf16>, vector<128x128xf32> -> vector<128x128xf32>
      %c0_34 = arith.constant 0 : index
      %c0_35 = arith.constant 0 : index
      %c0_36 = arith.constant 0 : index
      %42 = vector.load %arg5[%c0_34, %c0_35, %c0_36] : memref<1x1x128xf32, #tpu.memory_space<vmem>>, vector<1x1x128xf32>
      %43 = vector.shape_cast %42 : vector<1x1x128xf32> to vector<1x128xf32>
      %44 = vector.broadcast %43 : vector<1x128xf32> to vector<128x128xf32>
      %45 = arith.addf %41, %44 : vector<128x128xf32>
      %cst_37 = arith.constant dense<0.000000e+00> : vector<128xf32>
      %46 = vector.multi_reduction <add>, %45, %cst_37 [1] : vector<128x128xf32> to vector<128xf32>
      %47 = vector.shape_cast %46 : vector<128xf32> to vector<128x1xf32>
      %cst_38 = arith.constant 1.280000e+02 : f32
      %48 = vector.broadcast %cst_38 : f32 to vector<128x1xf32>
      %49 = arith.divf %47, %48 : vector<128x1xf32>
      %50 = vector.broadcast %49 : vector<128x1xf32> to vector<128x128xf32>
      %51 = arith.subf %45, %50 : vector<128x128xf32>
      %52 = arith.mulf %51, %51 : vector<128x128xf32>
      %cst_39 = arith.constant dense<0.000000e+00> : vector<128xf32>
      %53 = vector.multi_reduction <add>, %52, %cst_39 [1] : vector<128x128xf32> to vector<128xf32>
      %54 = vector.shape_cast %53 : vector<128xf32> to vector<128x1xf32>
      %cst_40 = arith.constant 1.280000e+02 : f32
      %55 = vector.broadcast %cst_40 : f32 to vector<128x1xf32>
      %56 = arith.divf %54, %55 : vector<128x1xf32>
      %57 = vector.broadcast %49 : vector<128x1xf32> to vector<128x128xf32>
      %58 = arith.subf %45, %57 : vector<128x128xf32>
      %cst_41 = arith.constant 9.99999974E-6 : f32
      %59 = vector.broadcast %cst_41 : f32 to vector<128x1xf32>
      %60 = arith.addf %56, %59 : vector<128x1xf32>
      %61 = math.rsqrt %60 : vector<128x1xf32>
      %62 = vector.broadcast %61 : vector<128x1xf32> to vector<128x128xf32>
      %63 = arith.mulf %58, %62 : vector<128x128xf32>
      %c0_42 = arith.constant 0 : index
      %c0_43 = arith.constant 0 : index
      %c0_44 = arith.constant 0 : index
      %64 = vector.load %arg6[%c0_42, %c0_43, %c0_44] : memref<1x1x128xf32, #tpu.memory_space<vmem>>, vector<1x1x128xf32>
      %65 = vector.shape_cast %64 : vector<1x1x128xf32> to vector<1x128xf32>
      %66 = vector.broadcast %65 : vector<1x128xf32> to vector<128x128xf32>
      %67 = arith.mulf %63, %66 : vector<128x128xf32>
      %c0_45 = arith.constant 0 : index
      %c0_46 = arith.constant 0 : index
      %c0_47 = arith.constant 0 : index
      %68 = vector.load %arg7[%c0_45, %c0_46, %c0_47] : memref<1x1x128xf32, #tpu.memory_space<vmem>>, vector<1x1x128xf32>
      %69 = vector.shape_cast %68 : vector<1x1x128xf32> to vector<1x128xf32>
      %70 = vector.broadcast %69 : vector<1x128xf32> to vector<128x128xf32>
      %71 = arith.addf %67, %70 : vector<128x128xf32>
      %72 = arith.truncf %71 : vector<128x128xf32> to vector<128x128xbf16>
      %c0_48 = arith.constant 0 : index
      %c0_49 = arith.constant 0 : index
      %73 = vector.load %arg12[%c0_48, %c0_49] : memref<128x128xbf16, #tpu.memory_space<vmem>>, vector<128x128xbf16>
      tpu.vector_store %arg12[%c0_48, %c0_49], %72 {strides = array<i32>} : memref<128x128xbf16, #tpu.memory_space<vmem>>, vector<128x128xbf16>,
      %cst_50 = arith.constant 0xFF800000 : f32
      %74 = vector.broadcast %cst_50 : f32 to vector<128x1xf32>
      %c0_51 = arith.constant 0 : index
      %c0_52 = arith.constant 0 : index
      %75 = vector.load %arg13[%c0_51, %c0_52] : memref<128x1xf32, #tpu.memory_space<vmem>>, vector<128x1xf32>
      tpu.vector_store %arg13[%c0_51, %c0_52], %74 {strides = array<i32>} : memref<128x1xf32, #tpu.memory_space<vmem>>, vector<128x1xf32>,
      %cst_53 = arith.constant 0.000000e+00 : f32
      %76 = vector.broadcast %cst_53 : f32 to vector<128x1xf32>
      %c0_54 = arith.constant 0 : index
      %c0_55 = arith.constant 0 : index
      %77 = vector.load %arg14[%c0_54, %c0_55] : memref<128x1xf32, #tpu.memory_space<vmem>>, vector<128x1xf32>
      tpu.vector_store %arg14[%c0_54, %c0_55], %76 {strides = array<i32>} : memref<128x1xf32, #tpu.memory_space<vmem>>, vector<128x1xf32>,
      %cst_56 = arith.constant 0.000000e+00 : f32
      %78 = vector.broadcast %cst_56 : f32 to vector<128x1xf32>
      %c0_57 = arith.constant 0 : index
      %c0_58 = arith.constant 0 : index
      %79 = vector.load %arg15[%c0_57, %c0_58] : memref<128x1xf32, #tpu.memory_space<vmem>>, vector<128x1xf32>
      tpu.vector_store %arg15[%c0_57, %c0_58], %78 {strides = array<i32>} : memref<128x1xf32, #tpu.memory_space<vmem>>, vector<128x1xf32>,
    } else {
    }
    %c0 = arith.constant 0 : index
    %c0_1 = arith.constant 0 : index
    %3 = vector.load %arg12[%c0, %c0_1] : memref<128x128xbf16, #tpu.memory_space<vmem>>, vector<128x128xbf16>
    %c0_2 = arith.constant 0 : index
    %c0_3 = arith.constant 0 : index
    %4 = vector.load %arg8[%c0_2, %c0_3] : memref<128x256xbf16, #tpu.memory_space<vmem>>, vector<128x256xbf16>
    %cst = arith.constant dense<0.000000e+00> : vector<128x256xf32>
    %5 = tpu.matmul %3, %4, %cst {dimension_numbers = #tpu.dot_dimension_numbers<[1], [0], [0], [1], [0, 0, 1, 1], [], []>} : vector<128x128xbf16>, vector<128x256xbf16>, vector<128x256xf32> -> vector<128x256xf32>
    %6 = arith.truncf %5 : vector<128x256xf32> to vector<128x256xbf16>
    %c0_4 = arith.constant 0 : index
    %c0_5 = arith.constant 0 : index
    %c0_6 = arith.constant 0 : index
    %7 = vector.load %arg10[%c0_4, %c0_5, %c0_6] : memref<1x128x256xbf16, #tpu.memory_space<vmem>>, vector<1x128x256xbf16>
    %8 = vector.shape_cast %7 : vector<1x128x256xbf16> to vector<128x256xbf16>
    %9 = vector.shape_cast %6 : vector<128x256xbf16> to vector<1x128x256xbf16>
    tpu.vector_store %arg10[%c0_4, %c0_5, %c0_6], %9 {strides = array<i32>} : memref<1x128x256xbf16, #tpu.memory_space<vmem>>, vector<1x128x256xbf16>,
    %cst_7 = arith.constant dense<0xFF800000> : vector<128xf32>
    %10 = vector.multi_reduction <maximumf>, %5, %cst_7 [1] : vector<128x256xf32> to vector<128xf32>
    %11 = vector.shape_cast %10 : vector<128xf32> to vector<128x1xf32>
    %c0_8 = arith.constant 0 : index
    %c0_9 = arith.constant 0 : index
    %12 = vector.load %arg13[%c0_8, %c0_9] : memref<128x1xf32, #tpu.memory_space<vmem>>, vector<128x1xf32>
    %13 = arith.maximumf %12, %11 : vector<128x1xf32>
    %c0_10 = arith.constant 0 : index
    %c0_11 = arith.constant 0 : index
    %14 = vector.load %arg14[%c0_10, %c0_11] : memref<128x1xf32, #tpu.memory_space<vmem>>, vector<128x1xf32>
    %c0_12 = arith.constant 0 : index
    %c0_13 = arith.constant 0 : index
    %15 = vector.load %arg13[%c0_12, %c0_13] : memref<128x1xf32, #tpu.memory_space<vmem>>, vector<128x1xf32>
    %16 = arith.subf %15, %13 : vector<128x1xf32>
    %17 = math.exp %16 : vector<128x1xf32>
    %18 = arith.mulf %14, %17 : vector<128x1xf32>
    %19 = vector.broadcast %13 : vector<128x1xf32> to vector<128x256xf32>
    %20 = arith.subf %5, %19 : vector<128x256xf32>
    %21 = math.exp %20 : vector<128x256xf32>
    %cst_14 = arith.constant dense<0.000000e+00> : vector<128xf32>
    %22 = vector.multi_reduction <add>, %21, %cst_14 [1] : vector<128x256xf32> to vector<128xf32>
    %23 = vector.shape_cast %22 : vector<128xf32> to vector<128x1xf32>
    %24 = arith.addf %18, %23 : vector<128x1xf32>
    %c0_15 = arith.constant 0 : index
    %c0_16 = arith.constant 0 : index
    %25 = vector.load %arg14[%c0_15, %c0_16] : memref<128x1xf32, #tpu.memory_space<vmem>>, vector<128x1xf32>
    tpu.vector_store %arg14[%c0_15, %c0_16], %24 {strides = array<i32>} : memref<128x1xf32, #tpu.memory_space<vmem>>, vector<128x1xf32>,
    %c0_17 = arith.constant 0 : index
    %c0_18 = arith.constant 0 : index
    %26 = vector.load %arg13[%c0_17, %c0_18] : memref<128x1xf32, #tpu.memory_space<vmem>>, vector<128x1xf32>
    tpu.vector_store %arg13[%c0_17, %c0_18], %13 {strides = array<i32>} : memref<128x1xf32, #tpu.memory_space<vmem>>, vector<128x1xf32>,
    %c0_19 = arith.constant 0 : index
    %c0_20 = arith.constant 0 : index
    %27 = vector.load %arg15[%c0_19, %c0_20] : memref<128x1xf32, #tpu.memory_space<vmem>>, vector<128x1xf32>
    %c0_21 = arith.constant 0 : index
    %c0_22 = arith.constant 0 : index
    %28 = vector.load %arg9[%c0_21, %c0_22] : memref<128x256xf32, #tpu.memory_space<vmem>>, vector<128x256xf32>
    %29 = arith.mulf %28, %5 : vector<128x256xf32>
    %cst_23 = arith.constant dense<0.000000e+00> : vector<128xf32>
    %30 = vector.multi_reduction <add>, %29, %cst_23 [1] : vector<128x256xf32> to vector<128xf32>
    %31 = vector.shape_cast %30 : vector<128xf32> to vector<128x1xf32>
    %32 = arith.addf %27, %31 : vector<128x1xf32>
    %c0_24 = arith.constant 0 : index
    %c0_25 = arith.constant 0 : index
    %33 = vector.load %arg15[%c0_24, %c0_25] : memref<128x1xf32, #tpu.memory_space<vmem>>, vector<128x1xf32>
    tpu.vector_store %arg15[%c0_24, %c0_25], %32 {strides = array<i32>} : memref<128x1xf32, #tpu.memory_space<vmem>>, vector<128x1xf32>,
    %c1_i32 = arith.constant 1 : i32
    %34 = arith.cmpi eq, %arg2, %c1_i32 : i32
    %35 = arith.extui %34 : i1 to i32
    %c0_i32_26 = arith.constant 0 : i32
    %36 = arith.cmpi ne, %35, %c0_i32_26 : i32
    scf.if %36 {
      %c0_27 = arith.constant 0 : index
      %c0_28 = arith.constant 0 : index
      %37 = vector.load %arg13[%c0_27, %c0_28] : memref<128x1xf32, #tpu.memory_space<vmem>>, vector<128x1xf32>
      %c0_29 = arith.constant 0 : index
      %c0_30 = arith.constant 0 : index
      %38 = vector.load %arg14[%c0_29, %c0_30] : memref<128x1xf32, #tpu.memory_space<vmem>>, vector<128x1xf32>
      %39 = math.log %38 : vector<128x1xf32>
      %40 = arith.addf %37, %39 : vector<128x1xf32>
      %c0_31 = arith.constant 0 : index
      %c0_32 = arith.constant 0 : index
      %41 = vector.load %arg15[%c0_31, %c0_32] : memref<128x1xf32, #tpu.memory_space<vmem>>, vector<128x1xf32>
      %42 = arith.subf %40, %41 : vector<128x1xf32>
      %43 = vector.shape_cast %42 : vector<128x1xf32> to vector<128x1xf32>
      %44 = vector.broadcast %43 : vector<128x1xf32> to vector<128x128xf32>
      %c0_33 = arith.constant 0 : index
      %c0_34 = arith.constant 0 : index
      %c0_35 = arith.constant 0 : index
      %45 = vector.load %arg11[%c0_33, %c0_34, %c0_35] : memref<1x128x128xf32, #tpu.memory_space<vmem>>, vector<1x128x128xf32>
      %46 = vector.shape_cast %45 : vector<1x128x128xf32> to vector<128x128xf32>
      %47 = vector.shape_cast %44 : vector<128x128xf32> to vector<1x128x128xf32>
      tpu.vector_store %arg11[%c0_33, %c0_34, %c0_35], %47 {strides = array<i32>} : memref<1x128x128xf32, #tpu.memory_space<vmem>>, vector<1x128x128xf32>,
    } else {
    }
    return
  }
  func.func @transform_0(%arg0: i32, %arg1: i32, %arg2: i32) -> (i32, i32, i32) {
    %c0_i32 = arith.constant 0 : i32
    %c0_i32_0 = arith.constant 0 : i32
    return %arg0, %arg1, %c0_i32 : i32, i32, i32
  }
  func.func @transform_1(%arg0: i32, %arg1: i32, %arg2: i32) -> (i32, i32, i32) {
    %c0_i32 = arith.constant 0 : i32
    %c0_i32_0 = arith.constant 0 : i32
    %c0_i32_1 = arith.constant 0 : i32
    return %arg0, %c0_i32, %c0_i32_0 : i32, i32, i32
  }
  func.func @transform_2(%arg0: i32, %arg1: i32, %arg2: i32) -> (i32, i32, i32) {
    %c0_i32 = arith.constant 0 : i32
    %c0_i32_0 = arith.constant 0 : i32
    %c0_i32_1 = arith.constant 0 : i32
    return %arg0, %c0_i32, %c0_i32_0 : i32, i32, i32
  }
  func.func @transform_3(%arg0: i32, %arg1: i32, %arg2: i32) -> (i32, i32, i32) {
    %c0_i32 = arith.constant 0 : i32
    %c0_i32_0 = arith.constant 0 : i32
    %c0_i32_1 = arith.constant 0 : i32
    return %arg0, %c0_i32, %c0_i32_0 : i32, i32, i32
  }
  func.func @transform_4(%arg0: i32, %arg1: i32, %arg2: i32) -> (i32, i32, i32) {
    %c0_i32 = arith.constant 0 : i32
    %c0_i32_0 = arith.constant 0 : i32
    %c0_i32_1 = arith.constant 0 : i32
    return %arg0, %c0_i32, %c0_i32_0 : i32, i32, i32
  }
  func.func @transform_5(%arg0: i32, %arg1: i32, %arg2: i32) -> (i32, i32) {
    %c0_i32 = arith.constant 0 : i32
    %c0_i32_0 = arith.constant 0 : i32
    return %c0_i32, %arg2 : i32, i32
  }
  func.func @transform_6(%arg0: i32, %arg1: i32, %arg2: i32) -> (i32, i32) {
    %c0_i32 = arith.constant 0 : i32
    return %arg1, %arg2 : i32, i32
  }
  func.func @transform_7(%arg0: i32, %arg1: i32, %arg2: i32) -> (i32, i32, i32) {
    %c0_i32 = arith.constant 0 : i32
    return %arg0, %arg1, %arg2 : i32, i32, i32
  }
  func.func @transform_8(%arg0: i32, %arg1: i32, %arg2: i32) -> (i32, i32, i32) {
    %c0_i32 = arith.constant 0 : i32
    %c0_i32_0 = arith.constant 0 : i32
    return %arg0, %arg1, %c0_i32 : i32, i32, i32
  }
}

</mosaic_0001>

<bundles_post_ra>
// kernel: tpu_custom_call.1
= control target key start
LH: loop header
LB: loop body
LE: loop exit
PB: predicated region body
PF: predicated region fallthrough
CT: control target
= control target key end

     0   :  { %s4840_s0 = inlined_call_operand.hbm [shape: bf16[3,128,128], index: 0, kind: input, shape index: {}]   ;;  %s4841_s1 = inlined_call_operand.hbm [shape: bf16[3,128,128], index: 1, kind: input, shape index: {}]   ;;  %s4842_s2 = inlined_call_operand.vmem [shape: f32[3,1,128], index: 2, kind: input, shape index: {}]   ;;  %s4843_s3 = inlined_call_operand.hbm [shape: f32[3,1,128], index: 3, kind: input, shape index: {}]   ;;  %s4844_s4 = inlined_call_operand.vmem [shape: f32[3,1,128], index: 4, kind: input, shape index: {}]   ;;  %s4845_s5 = inlined_call_operand.hbm [shape: bf16[128,512], index: 5, kind: input, shape index: {}]   ;;  %s4846_s6 = inlined_call_operand.hbm [shape: f32[128,512], index: 6, kind: input, shape index: {}]   ;;  %s4847_s7 = inlined_call_operand.hbm [shape: bf16[3,128,512], index: 7, kind: output, shape index: {0}]   ;;  %s4848_s8 = inlined_call_operand.hbm [shape: f32[3,128,128], index: 8, kind: output, shape index: {1}]  }
   0x1   :  { %4901 = sst [smem:[#allocation60_spill]] %s4841_s1 }
   0x2   :  { %4902 = sst [smem:[#allocation61_spill]] %s4842_s2 }
   0x3   :  { %4903 = sst [smem:[#allocation62_spill]] %s4844_s4 }
   0x4   :  { %4904 = sst [smem:[#allocation63_spill]] %s4845_s5 }
   0x5   :  { %4905 = sst [smem:[#allocation64_spill]] %s4847_s7 }
   0x6   :  { %4906 = sst [smem:[#allocation65_spill]] %s4848_s8 }
   0x7   :  { %14 = vsyncpa [#allocation7], 0 }
   0x8   :  { %16 = vsyncpa [#allocation7 + $0x1], 0 }
   0x9   :  { %17 = vsyncpa [#allocation10], 0 }
   0xa   :  { %19 = vsyncpa [#allocation10 + $0x1], 0 }
   0xb   :  { %20 = vsyncpa [#allocation13], 0 }
   0xc   :  { %22 = vsyncpa [#allocation13 + $0x1], 0 }
   0xd   :  { %23 = vsyncpa [#allocation8], 0 }
   0xe   :  { %25 = vsyncpa [#allocation8 + $0x1], 0 }
   0xf   :  { %26 = vsyncpa [#allocation17], 0 }
  0x10   :  { %28 = vsyncpa [#allocation17 + $0x1], 0  ;;  %s3648_s27 = smov 0   ;;  %s3650_s28 = smov 0  }
  0x11   :  { %s3652_s29 = smov 0   ;;  %s3654_s30 = smov 0  }
  0x12   :  { %s3656_s9 = smov 0   ;;  %s3658_s10 = smov 0  }
  0x13   :  { %s3660_s11 = smov 0   ;;  %s3662_s12 = smov 0  }
  0x14   :  { %s3664_s13 = smov 0   ;;  %s3666_s14 = smov 0  }
  0x15   :  { %s3668_s15 = smov 0   ;;  %s3670_s16 = smov 0  }
  0x16   :  { %s3672_s17 = smov 0   ;;  %s3674_s18 = smov 0  }
  0x17 LB: > { %4907 = sst [smem:[#allocation23_spill]] %s3528_s27  ;;  %s3719_s19 = sadd.s32 4294967295, %s3580_s18   ;;  %s3580_s18 = sphi %s3674_s18, %s34_s18   ;;  %s3576_s17 = sphi %s3672_s17, %s5052_s17   ;;  %s3572_s16 = sphi %s3670_s16, %s5051_s16   ;;  %s3568_s15 = sphi %s3668_s15, %s5050_s15   ;;  %s3564_s14 = sphi %s3666_s14, %s5049_s14   ;;  %s3560_s13 = sphi %s3664_s13, %s5048_s13   ;;  %s3556_s12 = sphi %s3662_s12, %s5047_s12   ;;  %s3552_s11 = sphi %s3660_s11, %s5036_s11   ;;  %s3548_s10 = sphi %s3658_s10, %s5046_s10   ;;  %s3544_s9 = sphi %s3656_s9, %s5045_s9   ;;  %s3540_s30 = sphi %s3654_s30, %s5044_s30   ;;  %s3536_s29 = sphi %s3652_s29, %s5043_s29   ;;  %s3532_s28 = sphi %s3650_s28, %s5042_s28   ;;  %s3528_s27 = sphi %s3648_s27, %s5032_s27  }
  0x18   : > { %4908 = sst [smem:[#allocation24_spill]] %s3532_s28  ;;  %s2608_s20 = sadd.s32 4294967294, %s3580_s18  }
  0x19   : > { %4909 = sst [smem:[#allocation25_spill]] %s3544_s9  ;;  %p69_p0 = scmp.ne.s32.totalorder %s3560_s13, %s3556_s12 }
  0x1a   : > { %4910 = sst [smem:[#allocation26_spill]] %s3552_s11  ;;  %p4863_p1 = scmp.eq.s32.totalorder %s3580_s18, 0 }
  0x1b   : > { %4911 = sst [smem:[#allocation27_spill]] %s3556_s12  ;;  %p75_p2 = scmp.ne.s32.totalorder %s3556_s12, %s3552_s11 }
  0x1c   : > { %4912 = sst [smem:[#allocation28_spill]] %s3560_s13  ;;  %p4849_p3 = scmp.eq.s32.totalorder %s3719_s19, 0 }
  0x1d   : > { %4913 = sst [smem:[#allocation29_spill]] %s3564_s14  ;;  %p3732_p4 = por %p4863_p1, %p69_p0 }
  0x1e   : > { %4914 = sst [smem:[#allocation30_spill]] %s3568_s15  ;;  %p260_p5 = scmp.ne.s32.totalorder %s3536_s29, %s3532_s28 }
  0x1f   : > { %4915 = sst [smem:[#allocation31_spill]] %s3719_s19  ;;  %p3740_p6 = por %p4849_p3, %p75_p2 }
  0x20   : > { %p261_p7 = scmp.eq.s32.totalorder %s3719_s19, 5  ;;  %p266_p8 = scmp.ne.s32.totalorder %s3532_s28, %s3528_s27 }
  0x21   : > { %s4917_s24 = scalar_select %p3740_p6, 1, 0 }
  0x22   : > { %p267_p9 = scmp.eq.s32.totalorder %s2608_s20, 5  ;;  %p3747_p10 = por %p261_p7, %p260_p5 }
  0x23   : > { %4918 = sst [smem:[#allocation32_spill]] %s4917_s24  ;;  %p3751_p11 = por %p261_p7, %p69_p0 }
  0x24   : > { %s4919_s25 = scalar_select %p3747_p10, 1, 0 }
  0x25   : > { %s4921_s26 = scalar_select %p3751_p11, 1, 0 }
  0x26   : > { %4920 = sst [smem:[#allocation33_spill]] %s4919_s25  ;;  %p3755_p12 = por %p267_p9, %p266_p8 }
  0x27   : > { %4922 = sst [smem:[#allocation34_spill]] %s4921_s26  ;;  %p3759_p13 = por %p267_p9, %p75_p2 }
  0x28   : > { %s4923_s22 = scalar_select %p3755_p12, 1, 0 }
  0x29   : > { %s4925_s21 = scalar_select %p3759_p13, 1, 0 }
  0x2a   : > { %4924 = sst [smem:[#allocation35_spill]] %s4923_s22  ;;  %p4862_p3 = scmp.lt.s32.totalorder %s3580_s18, 6 }
  0x2b   : > { %4926 = sst [smem:[#allocation36_spill]] %s4925_s21  ;;  %s3765_s11 = sand.u32 1, %s3560_s13  }
  0x2c   : > { %s4868_s20 = sshll.u32 %s3576_s17, 10  ;;  %s4867_s27 = sshll.u32 %s3765_s11, 6 }
  0x2d   : > { %p3773_p0 = pnand %p4862_p3, %p3732_p4  ;;  %s4869_s22 = sand.u32 1, %s3580_s18  }
  0x2e   : > { %s4928_s1 = sld [smem:[#allocation60_spill]]  ;;  %s342_s25 = scalar_lea.vmem [#allocation9], %s4867_s27 }
  0x2f   : > { %s349_s14 = sshll.u32 %s342_s25, 4  ;;  %s3787_s4 = scalar_lea.sflag [#allocation10], %s4869_s22  ;;  %s350_s14 = int_to_ptr.vmem [resolvable:$true] %s349_s14 }
  0x30   : > { %p4864_p2 = pneg %p3773_p0  ;;  %s3271_s23 = scalar_lea.vmem %s350_s14, 1024 }
  0x31   : > { %p3272_p4 = scmp.ne.s32.totalorder %s350_s14, %s3271_s23  ;;  %s3582_s2 = smov [#allocation9]  }
  0x32   : > { %s3276_s15 = sshll.u32 %s3582_s2, 4  ;;  %s3277_s15 = int_to_ptr.vmem [resolvable:$false] %s3276_s15 }
  0x33   : > { %p3274_p5 = pnand %p3272_p4, %p4864_p2  ;;  %s3278_s7 = scalar_lea.vmem %s3277_s15, 2048 }
  0x34   : > { %s348_s21 = scalar_lea.hbm %s4928_s1, %s4868_s20  ;;  %p3279_p8 = scmp.lt.s32.totalorder %s350_s14, %s3277_s15 }
  0x35   : > { %p3275_p7 = pneg %p3274_p5  ;;  %p3280_p9 = scmp.lt.s32.totalorder %s3278_s7, %s3271_s23 }
  0x37   : > { %p3281_p3 = por %p3280_p9, %p3279_p8 }
  0x39   : > { %p3282_p1 = pnand %p3281_p3, %p3275_p7 }
  0x3b   : > { %3285 = shalt.err (!%p3282_p1)
}
  0x3c   : > { %s4865_s25 = smov 64   ;;  %s4866_s2 = smov 4  }
  0x3d   : > { %2901 = dma.hbm_to_vmem [thread:$0]  (!%p3773_p0), %s348_s21, 1024, %s350_s14, %s3787_s4, %s4865_s25, %s4865_s25, %s4866_s2  }
  0x3e   : > { %p2624_p1 = scmp.ge.s32.totalorder %s3580_s18, 1  ;;  %p431_p3 = scmp.lt.s32.totalorder %s3580_s18, 7 }
  0x3f   : > { %s46_s26 = sadd.s32 1, %s3572_s16  ;;  %s192_s23 = sadd.s32 1, %s3548_s10 }
  0x40   : > { %p3802_p4 = pnand %p2624_p1, %p431_p3  ;;  %p47_p5 = scmp.ge.s32.totalorder %s46_s26, 2 }
  0x41   : > { %p199_p7 = scmp.ne.s32.totalorder %s3548_s10, %s3544_s9  ;;  %p205_p8 = scmp.ne.s32.totalorder %s3544_s9, %s3540_s30 }
  0x42   : > { %s4929_s15 = scalar_select %p3802_p4, 1, 0 }
  0x43   : > { %s5054_s26 = smov (%p47_p5, %s46_s26), 0  ;;  %s4932_s7 = sadd.s32 1, %s3576_s17 }
  0x44   : > { %4930 = sst [smem:[#allocation37_spill]] %s4929_s15  ;;  %s5056_s7 = smov (!%p47_p5, %s4932_s7), %s3576_s17 }
  0x45   : > { %4931 = sst [smem:[#allocation38_spill]] %s5054_s26  ;;  %s189_s14 = ssub.s32 %s3572_s16, %s5054_s26 }
  0x46   : > { %p4933_p9 = scmp.eq.s32.totalorder %s3580_s18, 0  ;;  %p55_p3 = scmp.ge.s32.totalorder %s5056_s7, 3 }
  0x47   : > { %p190_p2 = scmp.eq.s32.totalorder %s189_s14, 0  ;;  %p4935_p13 = scmp.eq.s32.totalorder %s3719_s19, 0 }
  0x48   : > { %p3821_p1 = por %p199_p7, %p4933_p9  ;;  %s250_s25 = sadd.s32 1, %s3536_s29 }
  0x49   : > { %p3827_p12 = por %p205_p8, %p4935_p13  ;;  %s5058_s7 = smov (%p55_p3, %s5056_s7), 0 }
  0x4a   : > { %4938 = sst [smem:[#allocation40_spill]] %s5058_s7  ;;  %s57_s27 = ssub.s32 %s3576_s17, %s5058_s7 }
  0x4b   : > { %s4936_s30 = scalar_select %p3827_p12, 1, 0 }
  0x4c   : > { %s3835_s2 = scalar_select %p190_p2, %s3548_s10, %s192_s23  }
  0x4d   : > { %4937 = sst [smem:[#allocation39_spill]] %s4936_s30  ;;  %s390_s20 = sand.u32 1, %s3548_s10  }
  0x4e   : > { %4939 = sst [smem:[#allocation41_spill]] %s3835_s2  ;;  %p60_p5 = scmp.eq.s32.totalorder %s57_s27, 0 }
  0x4f   : > { %s247_s22 = sor.u32 %s189_s14, %s57_s27  ;;  %s2618_s1 = sshll.u32 %s390_s20, 7 }
  0x50   : > { %p248_p7 = scmp.eq.s32.totalorder %s247_s22, 0  ;;  %s4940_s26 = sadd.s32 1, %s3560_s13 }
  0x51   : > { %s3845_s28 = scalar_select %p60_p5, %s3560_s13, %s4940_s26  }
  0x52   : > { %s3848_s30 = scalar_select %p248_p7, %s3536_s29, %s250_s25  }
  0x53   : > { %4941 = sst [smem:[#allocation42_spill]] %s3845_s28  ;;  %s2719_s9 = sshll.u32 %s3572_s16, 7 }
  0x54   : > { %4942 = sst [smem:[#allocation43_spill]] %s3848_s30  ;;  %s392_s15 = scalar_lea.vmem [#allocation12], %s2618_s1 }
  0x55   : > { %s4943_s5 = sld [smem:[#allocation63_spill]]  ;;  %s399_s23 = sshll.u32 %s392_s15, 4  ;;  %s400_s23 = int_to_ptr.vmem [resolvable:$true] %s399_s23 }
  0x56   : > { %p4944_p13 = scmp.lt.s32.totalorder %s3580_s18, 6  ;;  %s4946_s22 = sand.u32 1, %s3580_s18  }
  0x57   : > { %s3864_s26 = scalar_lea.sflag [#allocation13], %s4946_s22  ;;  %s3299_s25 = scalar_lea.vmem %s400_s23, 2048 }
  0x58   : > { %p3858_p2 = pnand %p4944_p13, %p3821_p1  ;;  %p3300_p9 = scmp.ne.s32.totalorder %s400_s23, %s3299_s25 }
  0x59   : > { %s3585_s1 = smov [#allocation12]  }
  0x5a   : > { %p4884_p8 = pneg %p3858_p2 }
  0x5b   : > { %s398_s12 = scalar_lea.hbm %s4943_s5, %s2719_s9  ;;  %s3304_s9 = sshll.u32 %s3585_s1, 4  ;;  %s3305_s9 = int_to_ptr.vmem [resolvable:$false] %s3304_s9 }
  0x5c   : > { %p3302_p3 = pnand %p3300_p9, %p4884_p8  ;;  %s3306_s19 = scalar_lea.vmem %s3305_s9, 4096 }
  0x5d   : > { %p3307_p1 = scmp.lt.s32.totalorder %s400_s23, %s3305_s9  ;;  %p3308_p7 = scmp.lt.s32.totalorder %s3306_s19, %s3299_s25 }
  0x5e   : > { %p3303_p5 = pneg %p3302_p3 }
  0x5f   : > { %p3309_p13 = por %p3308_p7, %p3307_p1 }
  0x61   : > { %p3310_p11 = pnand %p3309_p13, %p3303_p5 }
  0x63   : > { %3313 = shalt.err (!%p3310_p11)
}
  0x64   : > { %s3586_s24 = smov 256   ;;  %s3587_s15 = smov 128  }
  0x65   : > { %s3588_s14 = smov 8   ;;  %s2621_s21 = sshll.u32 %s390_s20, 8 }
  0x66   : > { %2907 = dma.hbm_to_vmem [thread:$0]  (!%p3858_p2), %s398_s12, 2048, %s400_s23, %s3864_s26, %s3586_s24, %s3587_s15, %s3588_s14  }
  0x67   : > { %s413_s22 = scalar_lea.vmem [#allocation14], %s2621_s21  ;;  %s4947_s1 = sshll.u32 %s3576_s17, 10 }
  0x68   : > { %s423_s25 = sshll.u32 %s413_s22, 4  ;;  %s327_s5 = scalar_lea.hbm %s4840_s0, %s4947_s1  ;;  %s3877_s25 = int_to_ptr.vmem [resolvable:$true] %s423_s25 }
  0x69   : > { %s4948_s7 = sshll.u32 %s3765_s11, 6  ;;  %s316_s2 = scalar_lea.sflag [#allocation7], %s3765_s11 }
  0x6a   : > { %s319_s28 = scalar_lea.vmem [#allocation6], %s4948_s7  ;;  %p4949_p9 = pneg %p3773_p0 }
  0x6b   : > { %s328_s13 = sshll.u32 %s319_s28, 4  ;;  %s3589_s12 = smov [#allocation6]   ;;  %s329_s13 = int_to_ptr.vmem [resolvable:$true] %s328_s13 }
  0x6c   : > { %s3327_s30 = scalar_lea.vmem %s329_s13, 1024  ;;  %s3332_s20 = sshll.u32 %s3589_s12, 4  ;;  %s3333_s20 = int_to_ptr.vmem [resolvable:$false] %s3332_s20 }
  0x6d   : > { %p3328_p11 = scmp.ne.s32.totalorder %s329_s13, %s3327_s30  ;;  %s3334_s23 = scalar_lea.vmem %s3333_s20, 2048 }
  0x6e   : > { %p3335_p1 = scmp.lt.s32.totalorder %s329_s13, %s3333_s20  ;;  %p3336_p7 = scmp.lt.s32.totalorder %s3334_s23, %s3327_s30 }
  0x6f   : > { %p3330_p3 = pnand %p3328_p11, %p4949_p9 }
  0x70   : > { %p3337_p13 = por %p3336_p7, %p3335_p1 }
  0x71   : > { %p3331_p5 = pneg %p3330_p3 }
  0x73   : > { %p3338_p8 = pnand %p3337_p13, %p3331_p5 }
  0x75   : > { %3341 = shalt.err (!%p3338_p8)
}
  0x76   : > { %s4950_s28 = smov 4   ;;  %s4951_s7 = smov 64  }
  0x77   : > { %2898 = dma.hbm_to_vmem [thread:$0]  (!%p3773_p0), %s327_s5, 1024, %s329_s13, %s316_s2, %s4951_s7, %s4951_s7, %s4950_s28  }
  0x78   : > { %s2617_s15 = sshll.u32 %s3576_s17, 4  ;;  %s368_s14 = scalar_lea.vmem [#allocation11], %s3765_s11 }
  0x79   : > { %s375_s21 = sshll.u32 %s368_s14, 4  ;;  %s373_s9 = scalar_lea.hbm %s4843_s3, %s2617_s15  ;;  %s376_s21 = int_to_ptr.vmem [resolvable:$true] %s375_s21 }
  0x7a   : > { %s3355_s30 = scalar_lea.vmem %s376_s21, 16  ;;  %p4952_p8 = pmov %p4949_p9 }
  0x7b   : > { %p3356_p11 = scmp.ne.s32.totalorder %s376_s21, %s3355_s30  ;;  %s3590_s19 = smov [#allocation11]  }
  0x7c   : > { %s3360_s12 = sshll.u32 %s3590_s19, 4  ;;  %s3361_s12 = int_to_ptr.vmem [resolvable:$false] %s3360_s12 }
  0x7d   : > { %p3358_p9 = pnand %p3356_p11, %p4952_p8  ;;  %s3362_s20 = scalar_lea.vmem %s3361_s12, 32 }
  0x7e   : > { %p3363_p5 = scmp.lt.s32.totalorder %s376_s21, %s3361_s12  ;;  %p3364_p1 = scmp.lt.s32.totalorder %s3362_s20, %s3355_s30 }
  0x7f   : > { %p3359_p3 = pneg %p3358_p9 }
  0x80   : > { %p3365_p7 = por %p3364_p1, %p3363_p5 }
  0x82   : > { %p3366_p13 = pnand %p3365_p7, %p3359_p3 }
  0x84   : > { %3369 = shalt.err (!%p3366_p13)
}
  0x85   : > { %2904 = dma.hbm_to_vmem [thread:$0]  (!%p3773_p0), %s373_s9, 16, %s376_s21, %s3787_s4  }
  0x86   : > { %s2720_s5 = sshll.u32 %s3572_s16, 8  ;;  %s3383_s23 = scalar_lea.vmem %s3877_s25, 4096 }
  0x87   : > { %s422_s2 = scalar_lea.hbm %s4846_s6, %s2720_s5  ;;  %p3384_p11 = scmp.ne.s32.totalorder %s3877_s25, %s3383_s23 }
  0x88   : > { %p4953_p8 = pneg %p3858_p2  ;;  %s3591_s28 = smov [#allocation14]  }
  0x89   : > { %s3388_s8 = sshll.u32 %s3591_s28, 4  ;;  %s3389_s8 = int_to_ptr.vmem [resolvable:$false] %s3388_s8 }
  0x8a   : > { %p3386_p9 = pnand %p3384_p11, %p4953_p8  ;;  %s3390_s7 = scalar_lea.vmem %s3389_s8, 8192 }
  0x8b   : > { %p3391_p5 = scmp.lt.s32.totalorder %s3877_s25, %s3389_s8  ;;  %p3392_p1 = scmp.lt.s32.totalorder %s3390_s7, %s3383_s23 }
  0x8c   : > { %p3387_p3 = pneg %p3386_p9 }
  0x8d   : > { %p3393_p7 = por %p3392_p1, %p3391_p5 }
  0x8f   : > { %p3394_p13 = pnand %p3393_p7, %p3387_p3 }
  0x91   : > { %3397 = shalt.err (!%p3394_p13)
}
  0x92   : > { %s3592_s4 = smov 512   ;;  %s3593_s15 = smov 16  }
  0x93   : > { %2910 = dma.hbm_to_vmem [thread:$0]  (!%p3858_p2), %s422_s2, 4096, %s3877_s25, %s3864_s26, %s3592_s4, %s3586_s24, %s3593_s15  }
  0x94   : > { %435 = sbr.rel (%p3802_p4) target bundleno = 1701 (0x6a5), region = 48 }
  0x99   : > { %s4955_s21 = sld [smem:[#allocation27_spill]] }
  0x9f   : > { %s3924_s1 = sand.u32 1, %s4955_s21  }
  0xa0   : > { %s2625_s9 = sshll.u32 %s3924_s1, 6  ;;  %s438_s30 = scalar_lea.sflag [#allocation7], %s3924_s1 }
  0xa1   : > { %s3928_s19 = scalar_lea.vmem [#allocation6], %s2625_s9 }
  0xa2   : > { %3507 = dma.done.wait (%p3740_p6), %s438_s30, 1024  }
  0xa3   : > { %3509 = vsyncadd (%p3740_p6), %s438_s30, 4294966272  ;;  %s4957_s27 = sld [smem:[#allocation31_spill]]  ;;  %s3935_s25 = scalar_lea.vmem [#allocation9], %s2625_s9 }
  0xa9   : > { %s446_s26 = sand.u32 1, %s4957_s27  }
  0xaa   : > { %s447_s24 = scalar_lea.sflag [#allocation10], %s446_s26 }
  0xab   : > { %3511 = dma.done.wait (%p3740_p6), %s447_s24, 1040  }
  0xac   : > { %3513 = vsyncadd (%p3740_p6), %s447_s24, 4294966256  ;;  %s4958_s12 = sld [smem:[#allocation25_spill]]  ;;  %s458_s13 = scalar_lea.vmem [#allocation11], %s3924_s1 }
  0xad   : > { %s464_s2 = scalar_lea.sflag [#allocation13], %s446_s26 }
  0xb2   : > { %s465_s5 = sand.u32 1, %s4958_s12  }
  0xb3   : > { %s2627_s11 = sshll.u32 %s465_s5, 7 }
  0xb4   : > { %s3943_s23 = scalar_lea.vmem [#allocation12], %s2627_s11 }
  0xb5   : > { %3515 = dma.done.wait (%p3827_p12), %s464_s2, 6144  }
  0xb6   : > { %3517 = vsyncadd (%p3827_p12), %s464_s2, 4294961152  ;;  %s4960_s28 = sld [smem:[#allocation24_spill]]  ;;  %s2628_s7 = sshll.u32 %s465_s5, 8 }
  0xb7   : > { %s4961_s8 = sld [smem:[#allocation30_spill]]  ;;  %s2630_s14 = sshll.u32 %s3924_s1, 7 }
  0xb8   : > { %s4962_s9 = sld [smem:[#allocation61_spill]]  ;;  %s3965_s20 = scalar_lea.vmem [#allocation14], %s2628_s7 }
  0xb9   : > { %s4963_s24 = sld [smem:[#allocation62_spill]]  ;;  %s3969_s11 = scalar_lea.vmem [#allocation16], %s2630_s14 }
  0xba   : > { %s4964_s2 = sld [smem:[#allocation29_spill]] }
  0xbc   : > { %s529_s4 = sand.u32 1, %s4960_s28  }
  0xbd   : > { %s2629_s15 = sshll.u32 %s529_s4, 7  ;;  %p540_p6 = scmp.lt.s32.totalorder %s4961_s8, 2 }
  0xbe   : > { %s3967_s5 = scalar_lea.vmem [#allocation15], %s2629_s15 }
  0xbf   : > { %s5060_s8 = smov (!%p540_p6, %s4961_s8), 2 }
  0xc0   : > { %s542_s30 = scalar_lea.vmem %s4962_s9, %s5060_s8  ;;  %s545_s12 = scalar_lea.vmem %s4963_s24, %s5060_s8 }
  0xc1   : > { %p2631_p12 = scmp.ne.s32.totalorder %s4964_s2, 0 }
  0xc3   : > { %556 = sbr.rel (%p2631_p12) target bundleno = 769 (0x301), region = 72 }
  0xc8   : > { %v3046_v0 = vld [vmem:[%s3935_s25 + $0x38] sm:$0xff]   ;;  %v3047_v1 = vld [vmem:[%s3935_s25 + $0x30] sm:$0xff]   ;;  %v3048_v2 = vld [vmem:[%s3935_s25 + $0x28] sm:$0xff]   ;;  %vm1092_vm0 = vcmask 7168  }
  0xc9   : > { %2817 = vmatprep.subr.bf16.mxu0 %v3046_v0  ;;  %2849 = vmatprep.subr.bf16.mxu1 %v3046_v0  ;;  %v3049_v3 = vld [vmem:[%s3935_s25 + $0x20] sm:$0xff]   ;;  %v3050_v6 = vld [vmem:[%s3935_s25 + $0x18] sm:$0xff]   ;;  %v3051_v7 = vld [vmem:[%s3935_s25 + $0x10] sm:$0xff]  }
  0xca   : > { %2818 = vmatpush3.bf16.msra.mxu0 %v3046_v0  ;;  %2857 = vmatpush3.bf16.msra.mxu1 %v3046_v0  ;;  %v3054_v4 = vld [vmem:[%s3928_s19] sm:$0xff]   ;;  %v3052_v8 = vld [vmem:[%s3935_s25 + $0x8] sm:$0xff]   ;;  %v3058_v12 = vld [vmem:[%s3928_s19 + $0x10] sm:$0xff]  }
  0xcb   : > { %2819 = vmatprep.subr.bf16.mxu0 %v3047_v1  ;;  %2850 = vmatprep.subr.bf16.mxu1 %v3047_v1  ;;  %v3055_v5 = vld [vmem:[%s3928_s19 + $0x20] sm:$0xff]   ;;  %v3056_v10 = vld [vmem:[%s3928_s19 + $0x8] sm:$0xff]   ;;  %v3060_v13 = vld [vmem:[%s3928_s19 + $0x30] sm:$0xff]  }
  0xcc   : > { %2833 = vmatprep.mubr.bf16.mxu0 %v3054_v4  ;;  %2841 = vmatprep.mubr.bf16.mxu1 %v3055_v5  ;;  %v3053_v9 = vld [vmem:[%s3935_s25] sm:$0xff]   ;;  %v3057_v11 = vld [vmem:[%s3928_s19 + $0x28] sm:$0xff]   ;;  %v3059_v14 = vld [vmem:[%s3928_s19 + $0x18] sm:$0xff]  }
  0xcd   : > { %v3061_v15 = vld [vmem:[%s3928_s19 + $0x38] sm:$0xff]   ;;  %v2632_v16 = vld [vmem:[%s542_s30] ss:$0 sm:$0xff] }
  0xce   : > { %2820 = vmatpush3.bf16.msra.mxu0 %v3047_v1  ;;  %2858 = vmatpush3.bf16.msra.mxu1 %v3047_v1 }
  0xcf   : > { %2821 = vmatprep.subr.bf16.mxu0 %v3048_v2  ;;  %2851 = vmatprep.subr.bf16.mxu1 %v3048_v2 }
  0xd2   : > { %2822 = vmatpush3.bf16.msra.mxu0 %v3048_v2  ;;  %2859 = vmatpush3.bf16.msra.mxu1 %v3048_v2 }
  0xd3   : > { %2823 = vmatprep.subr.bf16.mxu0 %v3049_v3  ;;  %2852 = vmatprep.subr.bf16.mxu1 %v3049_v3 }
  0xd6   : > { %2824 = vmatpush3.bf16.msra.mxu0 %v3049_v3  ;;  %2860 = vmatpush3.bf16.msra.mxu1 %v3049_v3 }
  0xd7   : > { %2825 = vmatprep.subr.bf16.mxu0 %v3050_v6  ;;  %2853 = vmatprep.subr.bf16.mxu1 %v3050_v6 }
  0xda   : > { %2826 = vmatpush3.bf16.msra.mxu0 %v3050_v6  ;;  %2861 = vmatpush3.bf16.msra.mxu1 %v3050_v6 }
  0xdb   : > { %2827 = vmatprep.subr.bf16.mxu0 %v3051_v7  ;;  %2854 = vmatprep.subr.bf16.mxu1 %v3051_v7 }
  0xde   : > { %2828 = vmatpush3.bf16.msra.mxu0 %v3051_v7  ;;  %2862 = vmatpush3.bf16.msra.mxu1 %v3051_v7 }
  0xdf   : > { %2829 = vmatprep.subr.bf16.mxu0 %v3052_v8  ;;  %2855 = vmatprep.subr.bf16.mxu1 %v3052_v8 }
  0xe2   : > { %2830 = vmatpush3.bf16.msra.mxu0 %v3052_v8  ;;  %2863 = vmatpush3.bf16.msra.mxu1 %v3052_v8 }
  0xe3   : > { %2831 = vmatprep.subr.bf16.mxu0 %v3053_v9  ;;  %2856 = vmatprep.subr.bf16.mxu1 %v3053_v9 }
  0xe6   : > { %2832 = vmatpush3.bf16.msra.mxu0 %v3053_v9  ;;  %2864 = vmatpush3.bf16.msra.mxu1 %v3053_v9 }
  0xe9   : > { %2834 = vmatmul.mubr.bf16.vlgmr.msra.gmra.mxu0 %v3056_v10  ;;  %2842 = vmatmul.mubr.bf16.vlgmr.msra.gmra.mxu1 %v3057_v11 }
  0xea   : > { %2837 = vmatprep.mubr.bf16.mxu0 %v3058_v12  ;;  %2845 = vmatprep.mubr.bf16.mxu1 %v3060_v13 }
  0xf1   : > { %2838 = vmatmul.mubr.bf16.gmra.mxu0 %v3059_v14  ;;  %2846 = vmatmul.mubr.bf16.gmra.mxu1 %v3061_v15 }
 0x1a9   : > { %v2835_v17 = vpop.f32.mrf.mxu0  ;;  %v2843_v18 = vpop.f32.mrf.mxu1 }
 0x1aa   : > { %v735_v19 = vadd.f32 %v2835_v17, %v2632_v16  ;;  %v767_v20 = vadd.f32 %v2843_v18, %v2632_v16 }
 0x1ab   : > { %v726_v21 = vpop.f32.mrf.mxu0  ;;  %v758_v22 = vpop.f32.mrf.mxu1 }
 0x1ac   : > { %809 = vadd.xlane.f32.xlu0 %v767_v20  ;;  %793 = vadd.xlane.f32.xlu1 %v735_v19  ;;  %v727_v25 = vadd.f32 %v2632_v16, %v726_v21  ;;  %v759_v30 = vadd.f32 %v2632_v16, %v758_v22 }
 0x1ad   : > { %v2836_v23 = vpop.f32.mrf.mxu0  ;;  %v2844_v24 = vpop.f32.mrf.mxu1 }
 0x1ae   : > { %v738_v26 = vadd.f32 %v2836_v23, %v2632_v16  ;;  %v770_v31 = vadd.f32 %v2844_v24, %v2632_v16 }
 0x1af   : > { %v729_v27 = vpop.f32.mrf.mxu0  ;;  %v761_v28 = vpop.f32.mrf.mxu1 }
 0x1b0   : > { %795 = vadd.xlane.f32.xlu1 %v738_v26  ;;  %789 = vadd.xlane.f32.xlu0 %v727_v25  ;;  %v730_v34 = vadd.f32 %v2632_v16, %v729_v27  ;;  %v762_v35 = vadd.f32 %v2632_v16, %v761_v28 }
 0x1b1   : > { %v2839_v29 = vpop.f32.mrf.mxu0  ;;  %v2847_v33 = vpop.f32.mrf.mxu1 }
 0x1b2   : > { %v751_v38 = vadd.f32 %v2839_v29, %v2632_v16  ;;  %v4008_v47 = vadd.f32 %v2847_v33, %v2632_v16 }
 0x1b3   : > { %v742_v32 = vpop.f32.mrf.mxu0  ;;  %v774_v37 = vpop.f32.mrf.mxu1 }
 0x1b4   : > { %811 = vadd.xlane.f32.xlu1 %v770_v31  ;;  %805 = vadd.xlane.f32.xlu0 %v759_v30  ;;  %v3996_v42 = vadd.f32 %v2632_v16, %v742_v32  ;;  %v4002_v45 = vadd.f32 %v2632_v16, %v774_v37 }
 0x1b5   : > { %v2840_v36 = vpop.f32.mrf.mxu0  ;;  %v2848_v41 = vpop.f32.mrf.mxu1 }
 0x1b6   : > { %v3993_v39 = vadd.f32 %v2840_v36, %v2632_v16  ;;  %v4010_v48 = vadd.f32 %v2848_v41, %v2632_v16 }
 0x1b7   : > { %v745_v40 = vpop.f32.mrf.mxu0  ;;  %v777_v44 = vpop.f32.mrf.mxu1 }
 0x1b8   : > { %807 = vadd.xlane.f32.xlu1 %v762_v35  ;;  %791 = vadd.xlane.f32.xlu0 %v730_v34  ;;  %v3998_v43 = vadd.f32 %v2632_v16, %v745_v40  ;;  %v4004_v46 = vadd.f32 %v2632_v16, %v777_v44 }
 0x1bc   : > { %803 = vadd.xlane.f32.xlu1 %v3993_v39  ;;  %801 = vadd.xlane.f32.xlu0 %v751_v38 }
 0x1c0   : > { %799 = vadd.xlane.f32.xlu1 %v3998_v43  ;;  %797 = vadd.xlane.f32.xlu0 %v3996_v42 }
 0x1c4   : > { %815 = vadd.xlane.f32.xlu1 %v4004_v46  ;;  %813 = vadd.xlane.f32.xlu0 %v4002_v45 }
 0x1c8   : > { %819 = vadd.xlane.f32.xlu1 %v4010_v48  ;;  %817 = vadd.xlane.f32.xlu0 %v4008_v47 }
 0x235   : > { %v810_v49 = vpop.xlane.xlu0 %809  ;;  %v794_v50 = vpop.xlane.xlu1 %793 }
 0x236   : > { %v832_v51 = vmul.f32 0.0078125, %v810_v49  ;;  %v824_v52 = vmul.f32 0.0078125, %v794_v50 }
 0x238   : > { %v4014_v53 = vsub.f32 %v735_v19, %v824_v52  ;;  %v4016_v56 = vsub.f32 %v767_v20, %v832_v51 }
 0x239   : > { %v796_v54 = vpop.xlane.xlu1 %795  ;;  %v790_v55 = vpop.xlane.xlu0 %789 }
 0x23a   : > { %v825_v57 = vmul.f32 0.0078125, %v796_v54  ;;  %v822_v58 = vmul.f32 0.0078125, %v790_v55  ;;  %v856_v59 = vmul.f32 %v4014_v53, %v4014_v53  ;;  %v864_v3 = vmul.f32 %v4016_v56, %v4016_v56 }
 0x23c   : > { %v4020_v60 = vsub.f32 %v738_v26, %v825_v57  ;;  %874 = vadd.xlane.f32.xlu0 %v856_v59  ;;  %v4022_v61 = vsub.f32 %v727_v25, %v822_v58 }
 0x23d   : > { %v812_v62 = vpop.xlane.xlu1 %811  ;;  %v806_v63 = vpop.xlane.xlu0 %805 }
 0x23e   : > { %v833_v0 = vmul.f32 0.0078125, %v812_v62  ;;  %v830_v1 = vmul.f32 0.0078125, %v806_v63  ;;  %v857_v2 = vmul.f32 %v4020_v60, %v4020_v60  ;;  %v854_v7 = vmul.f32 %v4022_v61, %v4022_v61 }
 0x240   : > { %v4028_v4 = vsub.f32 %v770_v31, %v833_v0  ;;  %876 = vadd.xlane.f32.xlu1 %v857_v2  ;;  %890 = vadd.xlane.f32.xlu0 %v864_v3  ;;  %v4032_v8 = vsub.f32 %v759_v30, %v830_v1 }
 0x241   : > { %v808_v5 = vpop.xlane.xlu1 %807  ;;  %v792_v6 = vpop.xlane.xlu0 %791 }
 0x242   : > { %v831_v9 = vmul.f32 0.0078125, %v808_v5  ;;  %v823_v10 = vmul.f32 0.0078125, %v792_v6  ;;  %v865_v11 = vmul.f32 %v4028_v4, %v4028_v4  ;;  %v862_v18 = vmul.f32 %v4032_v8, %v4032_v8 }
 0x244   : > { %v4036_v12 = vsub.f32 %v730_v34, %v823_v10  ;;  %892 = vadd.xlane.f32.xlu1 %v865_v11  ;;  %870 = vadd.xlane.f32.xlu0 %v854_v7  ;;  %v4038_v13 = vsub.f32 %v762_v35, %v831_v9 }
 0x245   : > { %v804_v14 = vpop.xlane.xlu1 %803  ;;  %v802_v15 = vpop.xlane.xlu0 %801 }
 0x246   : > { %v829_v16 = vmul.f32 0.0078125, %v804_v14  ;;  %v828_v17 = vmul.f32 0.0078125, %v802_v15  ;;  %v855_v19 = vmul.f32 %v4036_v12, %v4036_v12  ;;  %v863_v23 = vmul.f32 %v4038_v13, %v4038_v13 }
 0x248   : > { %v4044_v20 = vsub.f32 %v751_v38, %v828_v17  ;;  %886 = vadd.xlane.f32.xlu0 %v862_v18  ;;  %872 = vadd.xlane.f32.xlu1 %v855_v19  ;;  %v4049_v24 = vsub.f32 %v3993_v39, %v829_v16 }
 0x249   : > { %v800_v21 = vpop.xlane.xlu1 %799  ;;  %v798_v22 = vpop.xlane.xlu0 %797 }
 0x24a   : > { %v827_v25 = vmul.f32 0.0078125, %v800_v21  ;;  %v826_v26 = vmul.f32 0.0078125, %v798_v22  ;;  %v860_v27 = vmul.f32 %v4044_v20, %v4044_v20  ;;  %v861_v34 = vmul.f32 %v4049_v24, %v4049_v24  ;;  %v4135_v22 = vld [vmem:[%s458_s13] ss:$0 sm:$0xff] }
 0x24c   : > { %v4054_v28 = vsub.f32 %v3996_v42, %v826_v26  ;;  %888 = vadd.xlane.f32.xlu1 %v863_v23  ;;  %882 = vadd.xlane.f32.xlu0 %v860_v27  ;;  %v4057_v29 = vsub.f32 %v3998_v43, %v827_v25 }
 0x24d   : > { %v816_v30 = vpop.xlane.xlu1 %815  ;;  %v814_v31 = vpop.xlane.xlu0 %813 }
 0x24e   : > { %v835_v32 = vmul.f32 0.0078125, %v816_v30  ;;  %v834_v33 = vmul.f32 0.0078125, %v814_v31  ;;  %v858_v35 = vmul.f32 %v4054_v28, %v4054_v28  ;;  %v859_v39 = vmul.f32 %v4057_v29, %v4057_v29 }
 0x250   : > { %v4064_v36 = vsub.f32 %v4002_v45, %v834_v33  ;;  %884 = vadd.xlane.f32.xlu1 %v861_v34  ;;  %878 = vadd.xlane.f32.xlu0 %v858_v35  ;;  %v4069_v40 = vsub.f32 %v4004_v46, %v835_v32 }
 0x251   : > { %v820_v37 = vpop.xlane.xlu1 %819  ;;  %v818_v38 = vpop.xlane.xlu0 %817 }
 0x252   : > { %v837_v41 = vmul.f32 0.0078125, %v820_v37  ;;  %v836_v42 = vmul.f32 0.0078125, %v818_v38  ;;  %v866_v43 = vmul.f32 %v4064_v36, %v4064_v36  ;;  %v867_v49 = vmul.f32 %v4069_v40, %v4069_v40  ;;  %v4144_v37 = vld [vmem:[%s545_s12] ss:$0 sm:$0xff] }
 0x254   : > { %v4074_v44 = vsub.f32 %v4008_v47, %v836_v42  ;;  %880 = vadd.xlane.f32.xlu1 %v859_v39  ;;  %894 = vadd.xlane.f32.xlu0 %v866_v43  ;;  %v4077_v45 = vsub.f32 %v4010_v48, %v837_v41  ;;  %v3594_v47 = vmov -inf   ;;  %v3595_v48 = vmov 0.0  }
 0x255   : > { %1093 = vst.msk [vmem:[#allocation3] sm:$0xff] %vm1092_vm0, %v3594_v47  ;;  %1094 = vst.msk [vmem:[#allocation3 + $0x8] sm:$0xff] %vm1092_vm0, %v3594_v47 }
 0x256   : > { %v868_v46 = vmul.f32 %v4074_v44, %v4074_v44  ;;  %v869_v50 = vmul.f32 %v4077_v45, %v4077_v45  ;;  %1095 = vst.msk [vmem:[#allocation3 + $0x10] sm:$0xff] %vm1092_vm0, %v3594_v47  ;;  %1096 = vst.msk [vmem:[#allocation3 + $0x18] sm:$0xff] %vm1092_vm0, %v3594_v47 }
 0x257   : > { %1097 = vst.msk [vmem:[#allocation3 + $0x20] sm:$0xff] %vm1092_vm0, %v3594_v47  ;;  %1098 = vst.msk [vmem:[#allocation3 + $0x28] sm:$0xff] %vm1092_vm0, %v3594_v47 }
 0x258   : > { %896 = vadd.xlane.f32.xlu1 %v867_v49  ;;  %898 = vadd.xlane.f32.xlu0 %v868_v46  ;;  %1099 = vst.msk [vmem:[#allocation3 + $0x30] sm:$0xff] %vm1092_vm0, %v3594_v47  ;;  %1100 = vst.msk [vmem:[#allocation3 + $0x38] sm:$0xff] %vm1092_vm0, %v3594_v47 }
 0x259   : > { %1101 = vst.msk [vmem:[#allocation3 + $0x40] sm:$0xff] %vm1092_vm0, %v3594_v47  ;;  %1102 = vst.msk [vmem:[#allocation3 + $0x48] sm:$0xff] %vm1092_vm0, %v3594_v47 }
 0x25a   : > { %1103 = vst.msk [vmem:[#allocation3 + $0x50] sm:$0xff] %vm1092_vm0, %v3594_v47  ;;  %1104 = vst.msk [vmem:[#allocation3 + $0x58] sm:$0xff] %vm1092_vm0, %v3594_v47 }
 0x25b   : > { %1105 = vst.msk [vmem:[#allocation3 + $0x60] sm:$0xff] %vm1092_vm0, %v3594_v47  ;;  %1106 = vst.msk [vmem:[#allocation3 + $0x68] sm:$0xff] %vm1092_vm0, %v3594_v47 }
 0x25c   : > { %900 = vadd.xlane.f32.xlu1 %v869_v50  ;;  %1107 = vst.msk [vmem:[#allocation3 + $0x70] sm:$0xff] %vm1092_vm0, %v3594_v47  ;;  %1108 = vst.msk [vmem:[#allocation3 + $0x78] sm:$0xff] %vm1092_vm0, %v3594_v47 }
 0x25d   : > { %1109 = vst.msk [vmem:[#allocation4] sm:$0xff] %vm1092_vm0, %v3595_v48  ;;  %1110 = vst.msk [vmem:[#allocation4 + $0x8] sm:$0xff] %vm1092_vm0, %v3595_v48 }
 0x25e   : > { %1111 = vst.msk [vmem:[#allocation4 + $0x10] sm:$0xff] %vm1092_vm0, %v3595_v48  ;;  %1112 = vst.msk [vmem:[#allocation4 + $0x18] sm:$0xff] %vm1092_vm0, %v3595_v48 }
 0x25f   : > { %1113 = vst.msk [vmem:[#allocation4 + $0x20] sm:$0xff] %vm1092_vm0, %v3595_v48  ;;  %1114 = vst.msk [vmem:[#allocation4 + $0x28] sm:$0xff] %vm1092_vm0, %v3595_v48 }
 0x260   : > { %1115 = vst.msk [vmem:[#allocation4 + $0x30] sm:$0xff] %vm1092_vm0, %v3595_v48  ;;  %1116 = vst.msk [vmem:[#allocation4 + $0x38] sm:$0xff] %vm1092_vm0, %v3595_v48 }
 0x261   : > { %1117 = vst.msk [vmem:[#allocation4 + $0x40] sm:$0xff] %vm1092_vm0, %v3595_v48  ;;  %1118 = vst.msk [vmem:[#allocation4 + $0x48] sm:$0xff] %vm1092_vm0, %v3595_v48 }
 0x262   : > { %1119 = vst.msk [vmem:[#allocation4 + $0x50] sm:$0xff] %vm1092_vm0, %v3595_v48  ;;  %1120 = vst.msk [vmem:[#allocation4 + $0x58] sm:$0xff] %vm1092_vm0, %v3595_v48 }
 0x263   : > { %1121 = vst.msk [vmem:[#allocation4 + $0x60] sm:$0xff] %vm1092_vm0, %v3595_v48  ;;  %1122 = vst.msk [vmem:[#allocation4 + $0x68] sm:$0xff] %vm1092_vm0, %v3595_v48 }
 0x264   : > { %1123 = vst.msk [vmem:[#allocation4 + $0x70] sm:$0xff] %vm1092_vm0, %v3595_v48  ;;  %1124 = vst.msk [vmem:[#allocation4 + $0x78] sm:$0xff] %vm1092_vm0, %v3595_v48 }
 0x265   : > { %1125 = vst.msk [vmem:[#allocation5] sm:$0xff] %vm1092_vm0, %v3595_v48  ;;  %1126 = vst.msk [vmem:[#allocation5 + $0x8] sm:$0xff] %vm1092_vm0, %v3595_v48 }
 0x266   : > { %1127 = vst.msk [vmem:[#allocation5 + $0x10] sm:$0xff] %vm1092_vm0, %v3595_v48  ;;  %1128 = vst.msk [vmem:[#allocation5 + $0x18] sm:$0xff] %vm1092_vm0, %v3595_v48 }
 0x267   : > { %1129 = vst.msk [vmem:[#allocation5 + $0x20] sm:$0xff] %vm1092_vm0, %v3595_v48  ;;  %1130 = vst.msk [vmem:[#allocation5 + $0x28] sm:$0xff] %vm1092_vm0, %v3595_v48 }
 0x268   : > { %1131 = vst.msk [vmem:[#allocation5 + $0x30] sm:$0xff] %vm1092_vm0, %v3595_v48  ;;  %1132 = vst.msk [vmem:[#allocation5 + $0x38] sm:$0xff] %vm1092_vm0, %v3595_v48 }
 0x269   : > { %1133 = vst.msk [vmem:[#allocation5 + $0x40] sm:$0xff] %vm1092_vm0, %v3595_v48  ;;  %1134 = vst.msk [vmem:[#allocation5 + $0x48] sm:$0xff] %vm1092_vm0, %v3595_v48 }
 0x26a   : > { %1135 = vst.msk [vmem:[#allocation5 + $0x50] sm:$0xff] %vm1092_vm0, %v3595_v48  ;;  %1136 = vst.msk [vmem:[#allocation5 + $0x58] sm:$0xff] %vm1092_vm0, %v3595_v48 }
 0x26b   : > { %1137 = vst.msk [vmem:[#allocation5 + $0x60] sm:$0xff] %vm1092_vm0, %v3595_v48  ;;  %1138 = vst.msk [vmem:[#allocation5 + $0x68] sm:$0xff] %vm1092_vm0, %v3595_v48 }
 0x26c   : > { %1139 = vst.msk [vmem:[#allocation5 + $0x70] sm:$0xff] %vm1092_vm0, %v3595_v48  ;;  %1140 = vst.msk [vmem:[#allocation5 + $0x78] sm:$0xff] %vm1092_vm0, %v3595_v48 }
 0x2c5   : > { %v875_v51 = vpop.xlane.xlu0 %874 }
 0x2c6   : > { %v904_v52 = vmul.f32 0.0078125, %v875_v51 }
 0x2c8   : > { %v920_v54 = vadd.f32 1e-05, %v904_v52 }
 0x2c9   : > { %v877_v55 = vpop.xlane.xlu1 %876  ;;  %v891_v57 = vpop.xlane.xlu0 %890 }
 0x2ca   : > { %3062 = vrsqrt.f32 %v920_v54  ;;  %v905_v58 = vmul.f32 0.0078125, %v877_v55  ;;  %v912_v59 = vmul.f32 0.0078125, %v891_v57 }
 0x2cc   : > { %v921_v62 = vadd.f32 1e-05, %v905_v58  ;;  %v928_v63 = vadd.f32 1e-05, %v912_v59 }
 0x2cd   : > { %v893_v0 = vpop.xlane.xlu1 %892  ;;  %v871_v1 = vpop.xlane.xlu0 %870 }
 0x2ce   : > { %3064 = vrsqrt.f32 %v921_v62  ;;  %v913_v2 = vmul.f32 0.0078125, %v893_v0  ;;  %v902_v3 = vmul.f32 0.0078125, %v871_v1 }
 0x2cf   : > { %3066 = vrsqrt.f32 %v928_v63 }
 0x2d0   : > { %v929_v5 = vadd.f32 1e-05, %v913_v2  ;;  %v918_v6 = vadd.f32 1e-05, %v902_v3 }
 0x2d1   : > { %v873_v7 = vpop.xlane.xlu1 %872  ;;  %v887_v9 = vpop.xlane.xlu0 %886 }
 0x2d2   : > { %3068 = vrsqrt.f32 %v929_v5  ;;  %v903_v10 = vmul.f32 0.0078125, %v873_v7  ;;  %v910_v11 = vmul.f32 0.0078125, %v887_v9 }
 0x2d3   : > { %3070 = vrsqrt.f32 %v918_v6 }
 0x2d4   : > { %v919_v14 = vadd.f32 1e-05, %v903_v10  ;;  %v926_v15 = vadd.f32 1e-05, %v910_v11 }
 0x2d5   : > { %v889_v16 = vpop.xlane.xlu1 %888  ;;  %v883_v17 = vpop.xlane.xlu0 %882 }
 0x2d6   : > { %3072 = vrsqrt.f32 %v919_v14  ;;  %v911_v18 = vmul.f32 0.0078125, %v889_v16  ;;  %v908_v19 = vmul.f32 0.0078125, %v883_v17 }
 0x2d7   : > { %v3063_v21 = vpop.eup %3062  ;;  %3074 = vrsqrt.f32 %v926_v15 }
 0x2d8   : > { %v952_v23 = vmul.f32 %v3063_v21, %v4014_v53  ;;  %v927_v25 = vadd.f32 1e-05, %v911_v18  ;;  %v924_v26 = vadd.f32 1e-05, %v908_v19 }
 0x2d9   : > { %v885_v27 = vpop.xlane.xlu1 %884  ;;  %v879_v30 = vpop.xlane.xlu0 %878 }
 0x2da   : > { %3076 = vrsqrt.f32 %v927_v25  ;;  %v909_v31 = vmul.f32 0.0078125, %v885_v27  ;;  %v906_v32 = vmul.f32 0.0078125, %v879_v30  ;;  %v975_v34 = vmul.f32 %v4135_v22, %v952_v23 }
 0x2db   : > { %v3065_v33 = vpop.eup %3064  ;;  %3078 = vrsqrt.f32 %v924_v26 }
 0x2dc   : > { %v3067_v35 = vpop.eup %3066  ;;  %v953_v53 = vmul.f32 %v3065_v33, %v4020_v60  ;;  %v925_v38 = vadd.f32 1e-05, %v909_v31  ;;  %v922_v39 = vadd.f32 1e-05, %v906_v32  ;;  %v998_v48 = vadd.f32 %v4144_v37, %v975_v34 }
 0x2dd   : > { %v960_v41 = vmul.f32 %v3067_v35, %v4016_v56  ;;  %v881_v42 = vpop.xlane.xlu1 %880  ;;  %v895_v43 = vpop.xlane.xlu0 %894 }
 0x2de   : > { %v976_v49 = vmul.f32 %v4135_v22, %v953_v53  ;;  %3080 = vrsqrt.f32 %v925_v38  ;;  %v907_v46 = vmul.f32 0.0078125, %v881_v42  ;;  %v914_v50 = vmul.f32 0.0078125, %v895_v43 }
 0x2df   : > { %v3069_v47 = vpop.eup %3068  ;;  %v983_v51 = vmul.f32 %v4135_v22, %v960_v41  ;;  %3082 = vrsqrt.f32 %v922_v39 }
 0x2e0   : > { %v3071_v52 = vpop.eup %3070  ;;  %v999_v60 = vadd.f32 %v4144_v37, %v976_v49  ;;  %v961_v54 = vmul.f32 %v3069_v47, %v4028_v4  ;;  %v923_v55 = vadd.f32 1e-05, %v907_v46  ;;  %v930_v56 = vadd.f32 1e-05, %v914_v50 }
 0x2e1   : > { %v950_v57 = vmul.f32 %v3071_v52, %v4022_v61  ;;  %v897_v58 = vpop.xlane.xlu1 %896  ;;  %v899_v59 = vpop.xlane.xlu0 %898  ;;  %v1006_v4 = vadd.f32 %v4144_v37, %v983_v51 }
 0x2e2   : > { %v2762_v62 = vpack.c.bf16 %v999_v60, %v998_v48  ;;  %v984_v63 = vmul.f32 %v4135_v22, %v961_v54  ;;  %3084 = vrsqrt.f32 %v923_v55  ;;  %v915_v0 = vmul.f32 0.0078125, %v897_v58 }
 0x2e3   : > { %v3073_v1 = vpop.eup %3072  ;;  %v973_v2 = vmul.f32 %v4135_v22, %v950_v57  ;;  %3086 = vrsqrt.f32 %v930_v56  ;;  %v916_v3 = vmul.f32 0.0078125, %v899_v59 }
 0x2e4   : > { %v3075_v5 = vpop.eup %3074  ;;  %2794 = vst [vmem:[#allocation2 + $0x8] sm:$0xff] %v2762_v62   ;;  %v1007_v6 = vadd.f32 %v4144_v37, %v984_v63  ;;  %v951_v61 = vmul.f32 %v3073_v1, %v4036_v12  ;;  %v931_v7 = vadd.f32 1e-05, %v915_v0 }
 0x2e5   : > { %v958_v9 = vmul.f32 %v3075_v5, %v4032_v8  ;;  %v932_v10 = vadd.f32 1e-05, %v916_v3  ;;  %v901_v11 = vpop.xlane.xlu1 %900  ;;  %v996_v18 = vadd.f32 %v4144_v37, %v973_v2 }
 0x2e6   : > { %v2782_v14 = vpack.c.bf16 %v1007_v6, %v1006_v4  ;;  %v974_v15 = vmul.f32 %v4135_v22, %v951_v61  ;;  %3088 = vrsqrt.f32 %v931_v7  ;;  %v917_v16 = vmul.f32 0.0078125, %v901_v11 }
 0x2e7   : > { %v3077_v17 = vpop.eup %3076  ;;  %3090 = vrsqrt.f32 %v932_v10  ;;  %v981_v12 = vmul.f32 %v4135_v22, %v958_v9 }
 0x2e8   : > { %v3079_v19 = vpop.eup %3078  ;;  %2798 = vst [vmem:[#allocation2 + $0x28] sm:$0xff] %v2782_v14   ;;  %v997_v21 = vadd.f32 %v4144_v37, %v974_v15  ;;  %v959_v23 = vmul.f32 %v3077_v17, %v4038_v13  ;;  %v933_v8 = vadd.f32 1e-05, %v917_v16 }
 0x2e9   : > { %v956_v25 = vmul.f32 %v3079_v19, %v4044_v20  ;;  %v1004_v32 = vadd.f32 %v4144_v37, %v981_v12 }
 0x2ea   : > { %v2757_v26 = vpack.c.bf16 %v997_v21, %v996_v18  ;;  %v982_v27 = vmul.f32 %v4135_v22, %v959_v23  ;;  %3092 = vrsqrt.f32 %v933_v8 }
 0x2eb   : > { %v3081_v30 = vpop.eup %3080  ;;  %v979_v34 = vmul.f32 %v4135_v22, %v956_v25 }
 0x2ec   : > { %v3083_v31 = vpop.eup %3082  ;;  %2758 = vst [vmem:[#allocation2] sm:$0xff] %v2757_v26   ;;  %v1005_v33 = vadd.f32 %v4144_v37, %v982_v27  ;;  %v957_v35 = vmul.f32 %v3081_v30, %v4049_v24 }
 0x2ed   : > { %v954_v13 = vmul.f32 %v3083_v31, %v4054_v28  ;;  %v1002_v41 = vadd.f32 %v4144_v37, %v979_v34 }
 0x2ee   : > { %v2777_v53 = vpack.c.bf16 %v1005_v33, %v1004_v32  ;;  %v980_v20 = vmul.f32 %v4135_v22, %v957_v35 }
 0x2ef   : > { %v3085_v38 = vpop.eup %3084  ;;  %v977_v43 = vmul.f32 %v4135_v22, %v954_v13 }
 0x2f0   : > { %v3087_v39 = vpop.eup %3086  ;;  %2797 = vst [vmem:[#allocation2 + $0x20] sm:$0xff] %v2777_v53   ;;  %v1003_v42 = vadd.f32 %v4144_v37, %v980_v20  ;;  %v955_v49 = vmul.f32 %v3085_v38, %v4057_v29 }
 0x2f1   : > { %v962_v46 = vmul.f32 %v3087_v39, %v4064_v36  ;;  %v1000_v48 = vadd.f32 %v4144_v37, %v977_v43 }
 0x2f2   : > { %v2772_v50 = vpack.c.bf16 %v1003_v42, %v1002_v41  ;;  %v978_v24 = vmul.f32 %v4135_v22, %v955_v49 }
 0x2f3   : > { %v3089_v28 = vpop.eup %3088  ;;  %v985_v52 = vmul.f32 %v4135_v22, %v962_v46 }
 0x2f4   : > { %v3091_v47 = vpop.eup %3090  ;;  %2796 = vst [vmem:[#allocation2 + $0x18] sm:$0xff] %v2772_v50   ;;  %v1001_v51 = vadd.f32 %v4144_v37, %v978_v24  ;;  %v963_v60 = vmul.f32 %v3089_v28, %v4069_v40 }
 0x2f5   : > { %v964_v54 = vmul.f32 %v3091_v47, %v4074_v44  ;;  %v1008_v56 = vadd.f32 %v4144_v37, %v985_v52 }
 0x2f6   : > { %v2767_v55 = vpack.c.bf16 %v1001_v51, %v1000_v48  ;;  %v986_v29 = vmul.f32 %v4135_v22, %v963_v60 }
 0x2f7   : > { %v3093_v36 = vpop.eup %3092  ;;  %v987_v58 = vmul.f32 %v4135_v22, %v964_v54 }
 0x2f8   : > { %2795 = vst [vmem:[#allocation2 + $0x10] sm:$0xff] %v2767_v55   ;;  %v1009_v57 = vadd.f32 %v4144_v37, %v986_v29  ;;  %v965_v59 = vmul.f32 %v3093_v36, %v4077_v45 }
 0x2f9   : > { %v1010_v40 = vadd.f32 %v4144_v37, %v987_v58 }
 0x2fa   : > { %v2787_v62 = vpack.c.bf16 %v1009_v57, %v1008_v56  ;;  %v988_v63 = vmul.f32 %v4135_v22, %v965_v59 }
 0x2fc   : > { %2799 = vst [vmem:[#allocation2 + $0x30] sm:$0xff] %v2787_v62   ;;  %v1011_v44 = vadd.f32 %v4144_v37, %v988_v63 }
 0x2fe   : > { %v2792_v0 = vpack.c.bf16 %v1011_v44, %v1010_v40 }
 0x300   : > { %2800 = vst [vmem:[#allocation2 + $0x38] sm:$0xff] %v2792_v0  }
 0x301 PF: > { %v3096_v1 = vld [vmem:[%s3943_s23 + $0x74] ss:$8 sps:$4 sm:$0xff]   ;;  %v3098_v2 = vld [vmem:[%s3943_s23 + $0x70] ss:$8 sps:$4 sm:$0xff]   ;;  %v3596_v3 = vmov 0   ;;  %v3122_v19 = vld [vmem:[#allocation2 + $0x8] sm:$0xff]  }
 0x302   : > { %1333 = vmatprep.mubr.bf16.mxu0 %v3596_v3  ;;  %1373 = vmatprep.mubr.bf16.mxu1 %v3596_v3  ;;  %v3099_v45 = vld [vmem:[%s3943_s23 + $0x64] ss:$8 sps:$4 sm:$0xff]   ;;  %v3101_v22 = vld [vmem:[%s3943_s23 + $0x60] ss:$8 sps:$4 sm:$0xff]   ;;  %v3102_v37 = vld [vmem:[%s3943_s23 + $0x54] ss:$8 sps:$4 sm:$0xff]  }
 0x303   : > { %1301 = vmatprep.subr.bf16.mxu0 %v3096_v1  ;;  %2865 = vmatprep.subr.bf16.mxu1 %v3096_v1  ;;  %v3104_v5 = vld [vmem:[%s3943_s23 + $0x50] ss:$8 sps:$4 sm:$0xff]   ;;  %v3105_v4 = vld [vmem:[%s3943_s23 + $0x44] ss:$8 sps:$4 sm:$0xff]   ;;  %v3107_v6 = vld [vmem:[%s3943_s23 + $0x40] ss:$8 sps:$4 sm:$0xff]  }
 0x304   : > { %1302 = vmatpush1.bf16.msra.mxu0 %v3098_v2  ;;  %2873 = vmatpush1.bf16.msra.mxu1 %v3098_v2  ;;  %v3108_v61 = vld [vmem:[%s3943_s23 + $0x34] ss:$8 sps:$4 sm:$0xff]   ;;  %v3110_v7 = vld [vmem:[%s3943_s23 + $0x30] ss:$8 sps:$4 sm:$0xff]   ;;  %v3111_v9 = vld [vmem:[%s3943_s23 + $0x24] ss:$8 sps:$4 sm:$0xff]  }
 0x305   : > { %1303 = vmatprep.subr.bf16.mxu0 %v3099_v45  ;;  %2866 = vmatprep.subr.bf16.mxu1 %v3099_v45  ;;  %v3113_v10 = vld [vmem:[%s3943_s23 + $0x20] ss:$8 sps:$4 sm:$0xff]   ;;  %v3114_v11 = vld [vmem:[%s3943_s23 + $0x14] ss:$8 sps:$4 sm:$0xff]   ;;  %v3116_v14 = vld [vmem:[%s3943_s23 + $0x10] ss:$8 sps:$4 sm:$0xff]  }
 0x306   : > { %3095 = vset.pattern.permute.xlu0 %v3596_v3  ;;  %3094 = vset.pattern.permute.xlu1 %v3596_v3  ;;  %v3117_v15 = vld [vmem:[%s3943_s23 + $0x4] ss:$8 sps:$4 sm:$0xff]   ;;  %v3119_v16 = vld [vmem:[%s3943_s23] ss:$8 sps:$4 sm:$0xff]   ;;  %v3126_v8 = vld [vmem:[#allocation2 + $0x18] sm:$0xff]   ;;  %vm1926_vm1 = vcmask 7168  }
 0x307   : > { %v3120_v17 = vld [vmem:[#allocation2] sm:$0xff]   ;;  %v3123_v21 = vld [vmem:[#allocation2 + $0x28] sm:$0xff]   ;;  %v3124_v12 = vld [vmem:[#allocation2 + $0x10] sm:$0xff]   ;;  %s5015_s13 = sld [smem:[#allocation29_spill]] }
 0x308   : > { %1304 = vmatpush1.bf16.msra.mxu0 %v3101_v22  ;;  %2874 = vmatpush1.bf16.msra.mxu1 %v3101_v22  ;;  %v3121_v18 = vld [vmem:[#allocation2 + $0x20] sm:$0xff]   ;;  %v3125_v23 = vld [vmem:[#allocation2 + $0x30] sm:$0xff]   ;;  %v3127_v25 = vld [vmem:[#allocation2 + $0x38] sm:$0xff]  }
 0x309   : > { %1305 = vmatprep.subr.bf16.mxu0 %v3102_v37  ;;  %2867 = vmatprep.subr.bf16.mxu1 %v3102_v37 }
 0x30c   : > { %1306 = vmatpush1.bf16.msra.mxu0 %v3104_v5  ;;  %2875 = vmatpush1.bf16.msra.mxu1 %v3104_v5 }
 0x30d   : > { %1307 = vmatprep.subr.bf16.mxu0 %v3105_v4  ;;  %2868 = vmatprep.subr.bf16.mxu1 %v3105_v4  ;;  %p2707_p0 = scmp.ne.s32.totalorder %s5015_s13, 1 }
 0x310   : > { %1308 = vmatpush1.bf16.msra.mxu0 %v3107_v6  ;;  %2876 = vmatpush1.bf16.msra.mxu1 %v3107_v6 }
 0x311   : > { %1309 = vmatprep.subr.bf16.mxu0 %v3108_v61  ;;  %2869 = vmatprep.subr.bf16.mxu1 %v3108_v61 }
 0x314   : > { %1310 = vmatpush1.bf16.msra.mxu0 %v3110_v7  ;;  %2877 = vmatpush1.bf16.msra.mxu1 %v3110_v7 }
 0x315   : > { %1311 = vmatprep.subr.bf16.mxu0 %v3111_v9  ;;  %2870 = vmatprep.subr.bf16.mxu1 %v3111_v9 }
 0x318   : > { %1312 = vmatpush1.bf16.msra.mxu0 %v3113_v10  ;;  %2878 = vmatpush1.bf16.msra.mxu1 %v3113_v10 }
 0x319   : > { %1313 = vmatprep.subr.bf16.mxu0 %v3114_v11  ;;  %2871 = vmatprep.subr.bf16.mxu1 %v3114_v11 }
 0x31c   : > { %1314 = vmatpush1.bf16.msra.mxu0 %v3116_v14  ;;  %2879 = vmatpush1.bf16.msra.mxu1 %v3116_v14 }
 0x31d   : > { %1315 = vmatprep.subr.bf16.mxu0 %v3117_v15  ;;  %2872 = vmatprep.subr.bf16.mxu1 %v3117_v15 }
 0x320   : > { %1316 = vmatpush1.bf16.msra.mxu0 %v3119_v16  ;;  %2880 = vmatpush1.bf16.msra.mxu1 %v3119_v16 }
 0x323   : > { %1334 = vmatmul.mubr.bf16.vlgmr.msra.gmra.mxu0 %v3120_v17  ;;  %1374 = vmatmul.mubr.bf16.vlgmr.msra.gmra.mxu1 %v3121_v18  ;;  %v1976_v18 = vld [vmem:[%s3965_s20 + $0x8] sm:$0xff] }
 0x324   : > { %1343 = vmatprep.mubr.bf16.mxu0 %v3596_v3  ;;  %1383 = vmatprep.mubr.bf16.mxu1 %v3596_v3 }
 0x32b   : > { %1344 = vmatmul.mubr.bf16.gmra.mxu0 %v3122_v19  ;;  %1384 = vmatmul.mubr.bf16.gmra.mxu1 %v3123_v21 }
 0x32c   : > { %1353 = vmatprep.mubr.bf16.mxu0 %v3596_v3  ;;  %1393 = vmatprep.mubr.bf16.mxu1 %v3596_v3 }
 0x333   : > { %1354 = vmatmul.mubr.bf16.gmra.mxu0 %v3124_v12  ;;  %1394 = vmatmul.mubr.bf16.gmra.mxu1 %v3125_v23  ;;  %v1975_v23 = vld [vmem:[%s3965_s20] sm:$0xff] }
 0x334   : > { %1363 = vmatprep.mubr.bf16.mxu0 %v3596_v3  ;;  %1403 = vmatprep.mubr.bf16.mxu1 %v3596_v3 }
 0x33b   : > { %1364 = vmatmul.mubr.bf16.gmra.mxu0 %v3126_v8  ;;  %1404 = vmatmul.mubr.bf16.gmra.mxu1 %v3127_v25 }
 0x3e3   : > { %v4218_v26 = vpop.f32.mrf.mxu0  ;;  %v4220_v27 = vpop.f32.mrf.mxu1 }
 0x3e5   : > { %v4222_v30 = vpop.f32.mrf.mxu0  ;;  %v4224_v31 = vpop.f32.mrf.mxu1 }
 0x3e6   : > { %v2737_v32 = vpack.c.bf16 %v4222_v30, %v4218_v26  ;;  %v2745_v33 = vpack.c.bf16 %v4224_v31, %v4220_v27  ;;  %v1526_v34 = vmax.f32 %v4218_v26, %v4222_v30  ;;  %v1550_v42 = vmax.f32 %v4220_v27, %v4224_v31 }
 0x3e7   : > { %v4232_v35 = vpop.f32.mrf.mxu0  ;;  %v4234_v13 = vpop.f32.mrf.mxu1 }
 0x3e8   : > { %1510 = vst [vmem:[%s3967_s5] sm:$0xff] %v2737_v32  ;;  %1518 = vst [vmem:[%s3967_s5 + $0x40] sm:$0xff] %v2745_v33  ;;  %1527 = vmax.xlane.f32.xlu0 %v1526_v34  ;;  %v2008_v33 = vmul.f32 %v1976_v18, %v4222_v30  ;;  %v1979_v34 = vld [vmem:[%s3965_s20 + $0x20] sm:$0xff] }
 0x3e9   : > { %v4238_v53 = vpop.f32.mrf.mxu0  ;;  %v4240_v20 = vpop.f32.mrf.mxu1 }
 0x3ea   : > { %v2738_v38 = vpack.c.bf16 %v4238_v53, %v4232_v35  ;;  %v2746_v39 = vpack.c.bf16 %v4240_v20, %v4234_v13  ;;  %v1553_v41 = vmax.f32 %v4234_v13, %v4240_v20  ;;  %v1529_v47 = vmax.f32 %v4232_v35, %v4238_v53 }
 0x3eb   : > { %v4250_v43 = vpop.f32.mrf.mxu0  ;;  %v4252_v49 = vpop.f32.mrf.mxu1 }
 0x3ec   : > { %1511 = vst [vmem:[%s3967_s5 + $0x8] sm:$0xff] %v2738_v38  ;;  %1519 = vst [vmem:[%s3967_s5 + $0x48] sm:$0xff] %v2746_v39  ;;  %1554 = vmax.xlane.f32.xlu1 %v1553_v41  ;;  %1551 = vmax.xlane.f32.xlu0 %v1550_v42  ;;  %v1980_v38 = vld [vmem:[%s3965_s20 + $0x28] sm:$0xff]  ;;  %v2007_v39 = vmul.f32 %v1975_v23, %v4218_v26  ;;  %v4389_v23 = vld [vmem:[#allocation3 + $0x40] sm:$0xff] }
 0x3ed   : > { %v4256_v46 = vpop.f32.mrf.mxu0  ;;  %v4258_v50 = vpop.f32.mrf.mxu1 }
 0x3ee   : > { %v2739_v24 = vpack.c.bf16 %v4256_v46, %v4250_v43  ;;  %v2747_v28 = vpack.c.bf16 %v4258_v50, %v4252_v49  ;;  %v1532_v48 = vmax.f32 %v4250_v43, %v4256_v46  ;;  %v1556_v60 = vmax.f32 %v4252_v49, %v4258_v50 }
 0x3ef   : > { %v4268_v51 = vpop.f32.mrf.mxu0  ;;  %v4270_v52 = vpop.f32.mrf.mxu1  ;;  %v2039_v42 = vadd.f32 %v2008_v33, %v2007_v39  ;;  %v4404_v39 = vld [vmem:[#allocation3 + $0x10] sm:$0xff] }
 0x3f0   : > { %1512 = vst [vmem:[%s3967_s5 + $0x10] sm:$0xff] %v2739_v24  ;;  %1520 = vst [vmem:[%s3967_s5 + $0x50] sm:$0xff] %v2747_v28  ;;  %1530 = vmax.xlane.f32.xlu0 %v1529_v47  ;;  %1533 = vmax.xlane.f32.xlu1 %v1532_v48  ;;  %v2011_v24 = vmul.f32 %v1979_v34, %v4250_v43  ;;  %v2012_v28 = vmul.f32 %v1980_v38, %v4256_v46  ;;  %v1983_v47 = vld [vmem:[%s3965_s20 + $0x40] sm:$0xff]  ;;  %v1984_v48 = vld [vmem:[%s3965_s20 + $0x48] sm:$0xff] }
 0x3f1   : > { %v4276_v54 = vpop.f32.mrf.mxu0  ;;  %v4278_v55 = vpop.f32.mrf.mxu1  ;;  %v4402_v38 = vld [vmem:[#allocation3 + $0x8] sm:$0xff] }
 0x3f2   : > { %v2740_v29 = vpack.c.bf16 %v4276_v54, %v4268_v51  ;;  %v2748_v36 = vpack.c.bf16 %v4278_v55, %v4270_v52  ;;  %v1535_v56 = vmax.f32 %v4268_v51, %v4276_v54  ;;  %v1559_v40 = vmax.f32 %v4270_v52, %v4278_v55 }
 0x3f3   : > { %v4286_v57 = vpop.f32.mrf.mxu0  ;;  %v4288_v58 = vpop.f32.mrf.mxu1 }
 0x3f4   : > { %1513 = vst [vmem:[%s3967_s5 + $0x18] sm:$0xff] %v2740_v29  ;;  %1521 = vst [vmem:[%s3967_s5 + $0x58] sm:$0xff] %v2748_v36  ;;  %1557 = vmax.xlane.f32.xlu0 %v1556_v60  ;;  %1536 = vmax.xlane.f32.xlu1 %v1535_v56  ;;  %v2045_v60 = vadd.f32 %v2012_v28, %v2011_v24  ;;  %v2015_v29 = vmul.f32 %v1983_v47, %v4286_v57  ;;  %v1987_v56 = vld [vmem:[%s3965_s20 + $0x60] sm:$0xff] }
 0x3f5   : > { %v4292_v59 = vpop.f32.mrf.mxu0  ;;  %v4294_v62 = vpop.f32.mrf.mxu1 }
 0x3f6   : > { %v2741_v63 = vpack.c.bf16 %v4292_v59, %v4286_v57  ;;  %v1538_v44 = vmax.f32 %v4286_v57, %v4292_v59  ;;  %v2749_v0 = vpack.c.bf16 %v4294_v62, %v4288_v58  ;;  %v1562_v3 = vmax.f32 %v4288_v58, %v4294_v62 }
 0x3f7   : > { %v4304_v1 = vpop.f32.mrf.mxu0  ;;  %v4306_v2 = vpop.f32.mrf.mxu1  ;;  %v2016_v36 = vmul.f32 %v1984_v48, %v4292_v59 }
 0x3f8   : > { %1514 = vst [vmem:[%s3967_s5 + $0x20] sm:$0xff] %v2741_v63  ;;  %1560 = vmax.xlane.f32.xlu1 %v1559_v40  ;;  %1539 = vmax.xlane.f32.xlu0 %v1538_v44  ;;  %1522 = vst [vmem:[%s3967_s5 + $0x60] sm:$0xff] %v2749_v0  ;;  %v1988_v63 = vld [vmem:[%s3965_s20 + $0x68] sm:$0xff] }
 0x3f9   : > { %v4312_v45 = vpop.f32.mrf.mxu0  ;;  %v4314_v22 = vpop.f32.mrf.mxu1  ;;  %v2051_v40 = vadd.f32 %v2016_v36, %v2015_v29  ;;  %v4424_v29 = vld [vmem:[#allocation3 + $0x18] sm:$0xff] }
 0x3fa   : > { %v2742_v37 = vpack.c.bf16 %v4312_v45, %v4304_v1  ;;  %v1541_v5 = vmax.f32 %v4304_v1, %v4312_v45  ;;  %v2750_v4 = vpack.c.bf16 %v4314_v22, %v4306_v2  ;;  %v1565_v7 = vmax.f32 %v4306_v2, %v4314_v22 }
 0x3fb   : > { %v4322_v6 = vpop.f32.mrf.mxu0  ;;  %v4324_v61 = vpop.f32.mrf.mxu1 }
 0x3fc   : > { %1515 = vst [vmem:[%s3967_s5 + $0x28] sm:$0xff] %v2742_v37  ;;  %1563 = vmax.xlane.f32.xlu0 %v1562_v3  ;;  %1542 = vmax.xlane.f32.xlu1 %v1541_v5  ;;  %1523 = vst [vmem:[%s3967_s5 + $0x68] sm:$0xff] %v2750_v4  ;;  %v2019_v44 = vmul.f32 %v1987_v56, %v4322_v6  ;;  %v1991_v3 = vld [vmem:[%s3965_s20 + $0x80] sm:$0xff]  ;;  %v1992_v37 = vld [vmem:[%s3965_s20 + $0x88] sm:$0xff] }
 0x3fd   : > { %v4330_v9 = vpop.f32.mrf.mxu0  ;;  %v4332_v10 = vpop.f32.mrf.mxu1  ;;  %v2023_v4 = vmul.f32 %v1991_v3, %v4220_v27  ;;  %v4441_v3 = vld [vmem:[#allocation3 + $0x58] sm:$0xff] }
 0x3fe   : > { %v2743_v11 = vpack.c.bf16 %v4330_v9, %v4322_v6  ;;  %v1544_v14 = vmax.f32 %v4322_v6, %v4330_v9  ;;  %v2751_v15 = vpack.c.bf16 %v4332_v10, %v4324_v61  ;;  %v1568_v19 = vmax.f32 %v4324_v61, %v4332_v10 }
 0x3ff   : > { %v4340_v16 = vpop.f32.mrf.mxu0  ;;  %v4342_v17 = vpop.f32.mrf.mxu1  ;;  %v2020_v0 = vmul.f32 %v1988_v63, %v4330_v9 }
 0x400   : > { %1516 = vst [vmem:[%s3967_s5 + $0x30] sm:$0xff] %v2743_v11  ;;  %1566 = vmax.xlane.f32.xlu1 %v1565_v7  ;;  %1545 = vmax.xlane.f32.xlu0 %v1544_v14  ;;  %1524 = vst [vmem:[%s3967_s5 + $0x70] sm:$0xff] %v2751_v15  ;;  %v2024_v7 = vmul.f32 %v1992_v37, %v4224_v31  ;;  %v4382_v14 = vld [vmem:[#allocation3] sm:$0xff] }
 0x401   : > { %v4349_v21 = vpop.f32.mrf.mxu0  ;;  %v4351_v12 = vpop.f32.mrf.mxu1  ;;  %v2057_v5 = vadd.f32 %v2020_v0, %v2019_v44  ;;  %v4443_v37 = vld [vmem:[#allocation3 + $0x20] sm:$0xff] }
 0x402   : > { %v2744_v8 = vpack.c.bf16 %v4349_v21, %v4340_v16  ;;  %v1547_v25 = vmax.f32 %v4340_v16, %v4349_v21  ;;  %v2752_v32 = vpack.c.bf16 %v4351_v12, %v4342_v17  ;;  %v1571_v41 = vmax.f32 %v4342_v17, %v4351_v12  ;;  %4967 = vst [vmem:[#allocation44_spill] sm:$0xff] %v4443_v37 }
 0x403   : > { %v2063_v11 = vadd.f32 %v2024_v7, %v2023_v4  ;;  %v4480_v4 = vld [vmem:[#allocation3 + $0x68] sm:$0xff] }
 0x404   : > { %1517 = vst [vmem:[%s3967_s5 + $0x38] sm:$0xff] %v2744_v8  ;;  %1569 = vmax.xlane.f32.xlu0 %v1568_v19  ;;  %1548 = vmax.xlane.f32.xlu1 %v1547_v25  ;;  %1525 = vst [vmem:[%s3967_s5 + $0x78] sm:$0xff] %v2752_v32  ;;  %v4387_v19 = vld [vmem:[#allocation3 + $0x48] sm:$0xff] }
 0x405   : > { %4973 = vst [vmem:[#allocation50_spill] sm:$0xff] %v4480_v4 }
 0x408   : > { %2040 = vadd.xlane.f32.xlu0 %v2039_v42  ;;  %1572 = vmax.xlane.f32.xlu1 %v1571_v41  ;;  %v4501_v41 = vld [vmem:[#allocation3 + $0x38] sm:$0xff] }
 0x409   : > { %4978 = vst [vmem:[#allocation55_spill] sm:$0xff] %v4501_v41 }
 0x40c   : > { %2046 = vadd.xlane.f32.xlu0 %v2045_v60  ;;  %v4422_v60 = vld [vmem:[#allocation3 + $0x50] sm:$0xff] }
 0x410   : > { %2052 = vadd.xlane.f32.xlu0 %v2051_v40 }
 0x414   : > { %2058 = vadd.xlane.f32.xlu0 %v2057_v5  ;;  %v4482_v5 = vld [vmem:[#allocation3 + $0x30] sm:$0xff] }
 0x415   : > { %4974 = vst [vmem:[#allocation51_spill] sm:$0xff] %v4482_v5 }
 0x418   : > { %2064 = vadd.xlane.f32.xlu0 %v2063_v11 }
 0x471   : > { %v1528_v15 = vpop.xlane.xlu0 %1527 }
 0x472   : > { %v4385_v18 = vmax.f32 %v4382_v14, %v1528_v15 }
 0x474   : > { %1943 = vst.msk [vmem:[#allocation3] sm:$0xff] %vm1926_vm1, %v4385_v18  ;;  %1688 = vperm.xlu0 %3095, %v4385_v18  }
 0x475   : > { %v1555_v25 = vpop.xlane.xlu1 %1554  ;;  %v1552_v32 = vpop.xlane.xlu0 %1551 }
 0x476   : > { %v4397_v33 = vmax.f32 %v4387_v19, %v1555_v25  ;;  %v4400_v34 = vmax.f32 %v4389_v23, %v1552_v32  ;;  %v4460_v32 = vld [vmem:[#allocation3 + $0x60] sm:$0xff] }
 0x477   : > { %4969 = vst [vmem:[#allocation46_spill] sm:$0xff] %v4460_v32 }
 0x478   : > { %1952 = vst.msk [vmem:[#allocation3 + $0x48] sm:$0xff] %vm1926_vm1, %v4397_v33  ;;  %1951 = vst.msk [vmem:[#allocation3 + $0x40] sm:$0xff] %vm1926_vm1, %v4400_v34  ;;  %1733 = vperm.xlu0 %3095, %v4397_v33   ;;  %1728 = vperm.xlu1 %3094, %v4400_v34  }
 0x479   : > { %v1531_v24 = vpop.xlane.xlu0 %1530  ;;  %v1534_v28 = vpop.xlane.xlu1 %1533 }
 0x47a   : > { %v4417_v47 = vmax.f32 %v4402_v38, %v1531_v24  ;;  %v4420_v48 = vmax.f32 %v4404_v39, %v1534_v28  ;;  %v4462_v24 = vld [vmem:[#allocation3 + $0x28] sm:$0xff] }
 0x47b   : > { %4970 = vst [vmem:[#allocation47_spill] sm:$0xff] %v4462_v24 }
 0x47c   : > { %1944 = vst.msk [vmem:[#allocation3 + $0x8] sm:$0xff] %vm1926_vm1, %v4417_v47  ;;  %1945 = vst.msk [vmem:[#allocation3 + $0x10] sm:$0xff] %vm1926_vm1, %v4420_v48  ;;  %1693 = vperm.xlu1 %3094, %v4417_v47  }
 0x47d   : > { %v1558_v63 = vpop.xlane.xlu0 %1557  ;;  %v1537_v40 = vpop.xlane.xlu1 %1536 }
 0x47e   : > { %v4436_v44 = vmax.f32 %v4422_v60, %v1558_v63  ;;  %v4439_v0 = vmax.f32 %v4424_v29, %v1537_v40  ;;  %v4499_v63 = vld [vmem:[#allocation3 + $0x70] sm:$0xff] }
 0x47f   : > { %4977 = vst [vmem:[#allocation54_spill] sm:$0xff] %v4499_v63 }
 0x480   : > { %1953 = vst.msk [vmem:[#allocation3 + $0x50] sm:$0xff] %vm1926_vm1, %v4436_v44  ;;  %1946 = vst.msk [vmem:[#allocation3 + $0x18] sm:$0xff] %vm1926_vm1, %v4439_v0  ;;  %1698 = vperm.xlu1 %3094, %v4420_v48  }
 0x481   : > { %v1561_v7 = vpop.xlane.xlu1 %1560  ;;  %v1540_v11 = vpop.xlane.xlu0 %1539 }
 0x482   : > { %v4455_v15 = vmax.f32 %v4441_v3, %v1561_v7  ;;  %v4458_v25 = vmax.f32 %v4443_v37, %v1540_v11  ;;  %v1961_v37 = vld [vmem:[#allocation5 + $0x10] sm:$0xff] }
 0x484   : > { %4968 = vst [vmem:[#allocation45_spill] sm:$0xff] %v4458_v25  ;;  %1954 = vst.msk [vmem:[#allocation3 + $0x58] sm:$0xff] %vm1926_vm1, %v4455_v15  ;;  %1743 = vperm.xlu0 %3095, %v4455_v15   ;;  %1738 = vperm.xlu1 %3094, %v4436_v44  }
 0x485   : > { %1947 = vst.msk [vmem:[#allocation3 + $0x20] sm:$0xff] %vm1926_vm1, %v4458_v25  ;;  %v1564_v40 = vpop.xlane.xlu0 %1563  ;;  %v1543_v7 = vpop.xlane.xlu1 %1542 }
 0x486   : > { %v4475_v11 = vmax.f32 %v4460_v32, %v1564_v40  ;;  %v4478_v28 = vmax.f32 %v4462_v24, %v1543_v7  ;;  %v4519_v32 = vld [vmem:[#allocation3 + $0x78] sm:$0xff] }
 0x487   : > { %4981 = vst [vmem:[#allocation58_spill] sm:$0xff] %v4519_v32 }
 0x488   : > { %4971 = vst [vmem:[#allocation48_spill] sm:$0xff] %v4475_v11  ;;  %4972 = vst [vmem:[#allocation49_spill] sm:$0xff] %v4478_v28  ;;  %1703 = vperm.xlu1 %3094, %v4439_v0  }
 0x489   : > { %1955 = vst.msk [vmem:[#allocation3 + $0x60] sm:$0xff] %vm1926_vm1, %v4475_v11  ;;  %1948 = vst.msk [vmem:[#allocation3 + $0x28] sm:$0xff] %vm1926_vm1, %v4478_v28  ;;  %v1567_v40 = vpop.xlane.xlu1 %1566  ;;  %v1546_v7 = vpop.xlane.xlu0 %1545 }
 0x48a   : > { %v4494_v36 = vmax.f32 %v4480_v4, %v1567_v40  ;;  %v4497_v42 = vmax.f32 %v4482_v5, %v1546_v7  ;;  %v1959_v4 = vld [vmem:[#allocation5] sm:$0xff] }
 0x48c   : > { %4975 = vst [vmem:[#allocation52_spill] sm:$0xff] %v4494_v36  ;;  %4976 = vst [vmem:[#allocation53_spill] sm:$0xff] %v4497_v42  ;;  %1753 = vperm.xlu0 %3095, %v4494_v36   ;;  %1708 = vperm.xlu1 %3094, %v4458_v25  }
 0x48d   : > { %1956 = vst.msk [vmem:[#allocation3 + $0x68] sm:$0xff] %vm1926_vm1, %v4494_v36  ;;  %1949 = vst.msk [vmem:[#allocation3 + $0x30] sm:$0xff] %vm1926_vm1, %v4497_v42  ;;  %v1570_v40 = vpop.xlane.xlu0 %1569  ;;  %v1549_v7 = vpop.xlane.xlu1 %1548 }
 0x48e   : > { %v4514_v24 = vmax.f32 %v4499_v63, %v1570_v40  ;;  %v4517_v56 = vmax.f32 %v4501_v41, %v1549_v7  ;;  %v1963_v41 = vld [vmem:[#allocation5 + $0x20] sm:$0xff] }
 0x490   : > { %4979 = vst [vmem:[#allocation56_spill] sm:$0xff] %v4514_v24  ;;  %4980 = vst [vmem:[#allocation57_spill] sm:$0xff] %v4517_v56  ;;  %1748 = vperm.xlu1 %3094, %v4475_v11  }
 0x491   : > { %1957 = vst.msk [vmem:[#allocation3 + $0x70] sm:$0xff] %vm1926_vm1, %v4514_v24  ;;  %1950 = vst.msk [vmem:[#allocation3 + $0x38] sm:$0xff] %vm1926_vm1, %v4517_v56  ;;  %v2041_v40 = vpop.xlane.xlu0 %2040  ;;  %v1573_v7 = vpop.xlane.xlu1 %1572 }
 0x492   : > { %v2087_v5 = vadd.f32 %v2041_v40, %v1959_v4  ;;  %v4531_v25 = vmax.f32 %v4519_v32, %v1573_v7  ;;  %v1965_v40 = vld [vmem:[#allocation5 + $0x30] sm:$0xff] }
 0x494   : > { %4982 = vst [vmem:[#allocation59_spill] sm:$0xff] %v4531_v25  ;;  %2103 = vst.msk [vmem:[#allocation5] sm:$0xff] %vm1926_vm1, %v2087_v5  ;;  %1713 = vperm.xlu1 %3094, %v4478_v28   ;;  %1763 = vperm.xlu0 %3095, %v4531_v25  }
 0x495   : > { %1958 = vst.msk [vmem:[#allocation3 + $0x78] sm:$0xff] %vm1926_vm1, %v4531_v25  ;;  %v2047_v36 = vpop.xlane.xlu0 %2046  ;;  %v1967_v25 = vld [vmem:[#allocation5 + $0x40] sm:$0xff] }
 0x496   : > { %v2089_v63 = vadd.f32 %v2047_v36, %v1961_v37 }
 0x498   : > { %2105 = vst.msk [vmem:[#allocation5 + $0x10] sm:$0xff] %vm1926_vm1, %v2089_v63  ;;  %1718 = vperm.xlu1 %3094, %v4497_v42   ;;  %v1996_v63 = vld [vmem:[%s3965_s20 + $0xa8] sm:$0xff]  ;;  %v1981_v42 = vld [vmem:[%s3965_s20 + $0x30] sm:$0xff] }
 0x499   : > { %v2053_v5 = vpop.xlane.xlu0 %2052 }
 0x49a   : > { %v2091_v4 = vadd.f32 %v2053_v5, %v1963_v41  ;;  %v1995_v41 = vld [vmem:[%s3965_s20 + $0xa0] sm:$0xff] }
 0x49b   : > { %v2027_v5 = vmul.f32 %v1995_v41, %v4252_v49 }
 0x49c   : > { %2107 = vst.msk [vmem:[#allocation5 + $0x20] sm:$0xff] %vm1926_vm1, %v2091_v4  ;;  %1723 = vperm.xlu1 %3094, %v4517_v56   ;;  %v2028_v4 = vmul.f32 %v1996_v63, %v4258_v50  ;;  %v1982_v56 = vld [vmem:[%s3965_s20 + $0x38] sm:$0xff] }
 0x49d   : > { %v2059_v7 = vpop.xlane.xlu0 %2058 }
 0x49e   : > { %v2093_v8 = vadd.f32 %v2059_v7, %v1965_v40  ;;  %v1999_v40 = vld [vmem:[%s3965_s20 + $0xc0] sm:$0xff]  ;;  %v2000_v7 = vld [vmem:[%s3965_s20 + $0xc8] sm:$0xff] }
 0x49f   : > { %v2031_v32 = vmul.f32 %v1999_v40, %v4288_v58  ;;  %v1986_v40 = vld [vmem:[%s3965_s20 + $0x58] sm:$0xff] }
 0x4a0   : > { %2109 = vst.msk [vmem:[#allocation5 + $0x30] sm:$0xff] %vm1926_vm1, %v2093_v8  ;;  %1758 = vperm.xlu1 %3094, %v4514_v24   ;;  %v2069_v8 = vadd.f32 %v2028_v4, %v2027_v5  ;;  %v2032_v24 = vmul.f32 %v2000_v7, %v4294_v62  ;;  %v2014_v5 = vmul.f32 %v1982_v56, %v4276_v54  ;;  %v1985_v4 = vld [vmem:[%s3965_s20 + $0x50] sm:$0xff] }
 0x4a1   : > { %v2065_v36 = vpop.xlane.xlu0 %2064  ;;  %v2017_v7 = vmul.f32 %v1985_v4, %v4304_v1  ;;  %v1998_v4 = vld [vmem:[%s3965_s20 + $0xb8] sm:$0xff] }
 0x4a2   : > { %v2095_v37 = vadd.f32 %v2065_v36, %v1967_v25  ;;  %v2075_v25 = vadd.f32 %v2032_v24, %v2031_v32  ;;  %v1978_v36 = vld [vmem:[%s3965_s20 + $0x18] sm:$0xff]  ;;  %v2013_v32 = vmul.f32 %v1981_v42, %v4268_v51 }
 0x4a3   : > { %v2010_v41 = vmul.f32 %v1978_v36, %v4238_v53  ;;  %v1990_v36 = vld [vmem:[%s3965_s20 + $0x78] sm:$0xff] }
 0x4a4   : > { %2111 = vst.msk [vmem:[#allocation5 + $0x40] sm:$0xff] %vm1926_vm1, %v2095_v37  ;;  %v1977_v37 = vld [vmem:[%s3965_s20 + $0x10] sm:$0xff]  ;;  %v2048_v24 = vadd.f32 %v2014_v5, %v2013_v32 }
 0x4a5   : > { %v2009_v63 = vmul.f32 %v1977_v37, %v4232_v35  ;;  %v1997_v32 = vld [vmem:[%s3965_s20 + $0xb0] sm:$0xff] }
 0x4a7   : > { %v2042_v28 = vadd.f32 %v2010_v41, %v2009_v63  ;;  %v2022_v41 = vmul.f32 %v1990_v36, %v4349_v21  ;;  %v1993_v63 = vld [vmem:[%s3965_s20 + $0x90] sm:$0xff] }
 0x4b3   : > { %2070 = vadd.xlane.f32.xlu0 %v2069_v8  ;;  %v2018_v8 = vmul.f32 %v1986_v40, %v4312_v45  ;;  %v2025_v40 = vmul.f32 %v1993_v63, %v4234_v13 }
 0x4b5   : > { %v2054_v37 = vadd.f32 %v2018_v8, %v2017_v7  ;;  %v2030_v7 = vmul.f32 %v1998_v4, %v4278_v55  ;;  %v2001_v8 = vld [vmem:[%s3965_s20 + $0xd0] sm:$0xff] }
 0x4b7   : > { %2076 = vadd.xlane.f32.xlu0 %v2075_v25  ;;  %v1989_v25 = vld [vmem:[%s3965_s20 + $0x70] sm:$0xff] }
 0x4b8   : > { %v2021_v56 = vmul.f32 %v1989_v25, %v4340_v16  ;;  %v2002_v25 = vld [vmem:[%s3965_s20 + $0xd8] sm:$0xff] }
 0x4ba   : > { %v2060_v42 = vadd.f32 %v2022_v41, %v2021_v56  ;;  %v2034_v56 = vmul.f32 %v2002_v25, %v4314_v22 }
 0x4c4   : > { %2043 = vadd.xlane.f32.xlu1 %v2042_v28  ;;  %v1994_v28 = vld [vmem:[%s3965_s20 + $0x98] sm:$0xff] }
 0x4c5   : > { %v2026_v5 = vmul.f32 %v1994_v28, %v4240_v20 }
 0x4c7   : > { %v2066_v11 = vadd.f32 %v2026_v5, %v2025_v40 }
 0x4c8   : > { %2049 = vadd.xlane.f32.xlu1 %v2048_v24  ;;  %v2029_v24 = vmul.f32 %v1997_v32, %v4270_v52 }
 0x4ca   : > { %v2072_v36 = vadd.f32 %v2030_v7, %v2029_v24 }
 0x4cc   : > { %2055 = vadd.xlane.f32.xlu1 %v2054_v37  ;;  %v2033_v37 = vmul.f32 %v2001_v8, %v4306_v2 }
 0x4ce   : > { %v2078_v41 = vadd.f32 %v2034_v56, %v2033_v37 }
 0x4d0   : > { %2061 = vadd.xlane.f32.xlu1 %v2060_v42 }
 0x4d4   : > { %2067 = vadd.xlane.f32.xlu1 %v2066_v11 }
 0x4d8   : > { %2073 = vadd.xlane.f32.xlu1 %v2072_v36 }
 0x4dc   : > { %2079 = vadd.xlane.f32.xlu1 %v2078_v41 }
 0x4ef   : > { %v1689_v28 = vpop.permute.xlu0 %1688 }
 0x4f0   : > { %v1766_v42 = vsub.f32 %v4218_v26, %v1689_v28  ;;  %v1767_v63 = vsub.f32 %v4222_v30, %v1689_v28 }
 0x4f2   : > { %v1798_v5 = vmul.f32 1.442695, %v1766_v42  ;;  %v1800_v32 = vmul.f32 1.442695, %v1767_v63 }
 0x4f3   : > { %v1734_v40 = vpop.permute.xlu0 %1733  ;;  %v1729_v4 = vpop.permute.xlu1 %1728 }
 0x4f4   : > { %3128 = vpow2.f32 %v1798_v5  ;;  %v1784_v11 = vsub.f32 %v4234_v13, %v1734_v40  ;;  %v1785_v24 = vsub.f32 %v4240_v20, %v1734_v40  ;;  %v1782_v7 = vsub.f32 %v4220_v27, %v1729_v4 }
 0x4f5   : > { %3130 = vpow2.f32 %v1800_v32  ;;  %v1783_v8 = vsub.f32 %v4224_v31, %v1729_v4 }
 0x4f6   : > { %v1834_v25 = vmul.f32 1.442695, %v1784_v11  ;;  %v1836_v36 = vmul.f32 1.442695, %v1785_v24  ;;  %v1830_v37 = vmul.f32 1.442695, %v1782_v7 }
 0x4f7   : > { %v1832_v26 = vmul.f32 1.442695, %v1783_v8  ;;  %v1694_v56 = vpop.permute.xlu1 %1693 }
 0x4f8   : > { %3132 = vpow2.f32 %v1834_v25  ;;  %v1768_v30 = vsub.f32 %v4232_v35, %v1694_v56  ;;  %v1769_v41 = vsub.f32 %v4238_v53, %v1694_v56 }
 0x4f9   : > { %3134 = vpow2.f32 %v1836_v36 }
 0x4fa   : > { %3136 = vpow2.f32 %v1830_v37  ;;  %v1802_v13 = vmul.f32 1.442695, %v1768_v30  ;;  %v1804_v28 = vmul.f32 1.442695, %v1769_v41 }
 0x4fb   : > { %3138 = vpow2.f32 %v1832_v26  ;;  %v1699_v20 = vpop.permute.xlu1 %1698 }
 0x4fc   : > { %3140 = vpow2.f32 %v1802_v13  ;;  %v1770_v27 = vsub.f32 %v4250_v43, %v1699_v20  ;;  %v1771_v31 = vsub.f32 %v4256_v46, %v1699_v20 }
 0x4fd   : > { %3142 = vpow2.f32 %v1804_v28 }
 0x4fe   : > { %v1806_v42 = vmul.f32 1.442695, %v1770_v27  ;;  %v1808_v63 = vmul.f32 1.442695, %v1771_v31 }
 0x4ff   : > { %v1744_v5 = vpop.permute.xlu0 %1743  ;;  %v1739_v32 = vpop.permute.xlu1 %1738 }
 0x500   : > { %3144 = vpow2.f32 %v1806_v42  ;;  %v1786_v35 = vsub.f32 %v4252_v49, %v1739_v32  ;;  %v1787_v40 = vsub.f32 %v4258_v50, %v1739_v32  ;;  %v1788_v11 = vsub.f32 %v4270_v52, %v1744_v5 }
 0x501   : > { %v3129_v53 = vpop.eup %3128  ;;  %3146 = vpow2.f32 %v1808_v63  ;;  %v1789_v43 = vsub.f32 %v4278_v55, %v1744_v5 }
 0x502   : > { %v3131_v4 = vpop.eup %3130  ;;  %v1838_v24 = vmul.f32 1.442695, %v1786_v35  ;;  %v1840_v7 = vmul.f32 1.442695, %v1787_v40  ;;  %v1842_v26 = vmul.f32 1.442695, %v1788_v11 }
 0x503   : > { %v1704_v46 = vpop.permute.xlu1 %1703  ;;  %v1862_v8 = vadd.f32 %v3131_v4, %v3129_v53  ;;  %v1844_v41 = vmul.f32 1.442695, %v1789_v43 }
 0x504   : > { %v1772_v25 = vsub.f32 %v4268_v51, %v1704_v46  ;;  %v1773_v36 = vsub.f32 %v4276_v54, %v1704_v46  ;;  %3148 = vpow2.f32 %v1838_v24 }
 0x505   : > { %v3133_v37 = vpop.eup %3132  ;;  %1863 = vadd.xlane.f32.xlu1 %v1862_v8  ;;  %3150 = vpow2.f32 %v1840_v7 }
 0x506   : > { %v3135_v49 = vpop.eup %3134  ;;  %v1810_v56 = vmul.f32 1.442695, %v1772_v25  ;;  %v1812_v50 = vmul.f32 1.442695, %v1773_v36 }
 0x507   : > { %v3137_v30 = vpop.eup %3136  ;;  %v1709_v52 = vpop.permute.xlu1 %1708  ;;  %v1889_v13 = vadd.f32 %v3135_v49, %v3133_v37 }
 0x508   : > { %v3139_v55 = vpop.eup %3138  ;;  %3152 = vpow2.f32 %v1810_v56  ;;  %v1774_v28 = vsub.f32 %v4286_v57, %v1709_v52  ;;  %v1754_v51 = vpop.permute.xlu0 %1753  ;;  %v1775_v54 = vsub.f32 %v4292_v59, %v1709_v52 }
 0x509   : > { %v3141_v20 = vpop.eup %3140  ;;  %3154 = vpow2.f32 %v1812_v50  ;;  %1890 = vadd.xlane.f32.xlu1 %v1889_v13  ;;  %v1886_v27 = vadd.f32 %v3139_v55, %v3137_v30  ;;  %v1792_v35 = vsub.f32 %v4306_v2, %v1754_v51  ;;  %v1793_v4 = vsub.f32 %v4314_v22, %v1754_v51 }
 0x50a   : > { %v3143_v31 = vpop.eup %3142  ;;  %3156 = vpow2.f32 %v1842_v26  ;;  %v1814_v42 = vmul.f32 1.442695, %v1774_v28  ;;  %v1816_v63 = vmul.f32 1.442695, %v1775_v54 }
 0x50b   : > { %3158 = vpow2.f32 %v1844_v41  ;;  %1887 = vadd.xlane.f32.xlu0 %v1886_v27  ;;  %v1749_v5 = vpop.permute.xlu1 %1748  ;;  %v1865_v32 = vadd.f32 %v3143_v31, %v3141_v20  ;;  %v1850_v46 = vmul.f32 1.442695, %v1792_v35  ;;  %v1852_v2 = vmul.f32 1.442695, %v1793_v4 }
 0x50c   : > { %v1790_v53 = vsub.f32 %v4288_v58, %v1749_v5  ;;  %v1791_v57 = vsub.f32 %v4294_v62, %v1749_v5  ;;  %3160 = vpow2.f32 %v1814_v42 }
 0x50d   : > { %v3145_v40 = vpop.eup %3144  ;;  %3162 = vpow2.f32 %v1816_v63 }
 0x50e   : > { %v3147_v59 = vpop.eup %3146  ;;  %v1846_v11 = vmul.f32 1.442695, %v1790_v53  ;;  %v1848_v24 = vmul.f32 1.442695, %v1791_v57 }
 0x50f   : > { %1866 = vadd.xlane.f32.xlu0 %v1865_v32  ;;  %v1714_v43 = vpop.permute.xlu1 %1713  ;;  %v1868_v7 = vadd.f32 %v3147_v59, %v3145_v40  ;;  %v1764_v36 = vpop.permute.xlu0 %1763 }
 0x510   : > { %3164 = vpow2.f32 %v1846_v11  ;;  %v1776_v8 = vsub.f32 %v4304_v1, %v1714_v43  ;;  %v1777_v58 = vsub.f32 %v4312_v45, %v1714_v43  ;;  %v1796_v41 = vsub.f32 %v4342_v17, %v1764_v36 }
 0x511   : > { %3166 = vpow2.f32 %v1848_v24  ;;  %v3149_v25 = vpop.eup %3148  ;;  %v1797_v55 = vsub.f32 %v4351_v12, %v1764_v36 }
 0x512   : > { %v1818_v62 = vmul.f32 1.442695, %v1776_v8  ;;  %v1820_v22 = vmul.f32 1.442695, %v1777_v58  ;;  %v3151_v49 = vpop.eup %3150  ;;  %3168 = vpow2.f32 %v1850_v46  ;;  %v1858_v54 = vmul.f32 1.442695, %v1796_v41 }
 0x513   : > { %1869 = vadd.xlane.f32.xlu0 %v1868_v7  ;;  %v1719_v37 = vpop.permute.xlu1 %1718  ;;  %3170 = vpow2.f32 %v1852_v2  ;;  %v1892_v30 = vadd.f32 %v3151_v49, %v3149_v25  ;;  %v1860_v63 = vmul.f32 1.442695, %v1797_v55  ;;  %v2005_v41 = vld [vmem:[%s3965_s20 + $0xf0] sm:$0xff] }
 0x514   : > { %v1778_v26 = vsub.f32 %v4322_v6, %v1719_v37  ;;  %v1779_v56 = vsub.f32 %v4330_v9, %v1719_v37  ;;  %3172 = vpow2.f32 %v1818_v62 }
 0x515   : > { %v3153_v50 = vpop.eup %3152  ;;  %3174 = vpow2.f32 %v1820_v22 }
 0x516   : > { %v3155_v1 = vpop.eup %3154  ;;  %v1822_v45 = vmul.f32 1.442695, %v1778_v26  ;;  %v1824_v52 = vmul.f32 1.442695, %v1779_v56  ;;  %v2003_v56 = vld [vmem:[%s3965_s20 + $0xe0] sm:$0xff] }
 0x517   : > { %v3157_v13 = vpop.eup %3156  ;;  %1893 = vadd.xlane.f32.xlu0 %v1892_v30  ;;  %v1724_v28 = vpop.permute.xlu1 %1723  ;;  %v1871_v20 = vadd.f32 %v3155_v1, %v3153_v50  ;;  %v2004_v50 = vld [vmem:[%s3965_s20 + $0xe8] sm:$0xff] }
 0x518   : > { %v3159_v51 = vpop.eup %3158  ;;  %3176 = vpow2.f32 %v1822_v45  ;;  %v1780_v6 = vsub.f32 %v4340_v16, %v1724_v28  ;;  %v1781_v9 = vsub.f32 %v4349_v21, %v1724_v28  ;;  %v2006_v45 = vld [vmem:[%s3965_s20 + $0xf8] sm:$0xff]  ;;  %v2036_v55 = vmul.f32 %v2004_v50, %v4332_v10 }
 0x519   : > { %3178 = vpow2.f32 %v1824_v52  ;;  %1872 = vadd.xlane.f32.xlu1 %v1871_v20  ;;  %v3161_v42 = vpop.eup %3160  ;;  %v1895_v32 = vadd.f32 %v3159_v51, %v3157_v13  ;;  %v2035_v13 = vmul.f32 %v2003_v56, %v4324_v61  ;;  %v2037_v20 = vmul.f32 %v2005_v41, %v4342_v17 }
 0x51a   : > { %v1826_v27 = vmul.f32 1.442695, %v1780_v6  ;;  %v1828_v31 = vmul.f32 1.442695, %v1781_v9  ;;  %v3163_v35 = vpop.eup %3162  ;;  %v2038_v51 = vmul.f32 %v2006_v45, %v4351_v12 }
 0x51b   : > { %v1759_v5 = vpop.permute.xlu1 %1758  ;;  %v1874_v16 = vadd.f32 %v3163_v35, %v3161_v42  ;;  %v2081_v6 = vadd.f32 %v2036_v55, %v2035_v13  ;;  %v1971_v42 = vld [vmem:[#allocation5 + $0x60] sm:$0xff] }
 0x51c   : > { %3180 = vpow2.f32 %v1826_v27  ;;  %v1794_v53 = vsub.f32 %v4324_v61, %v1759_v5  ;;  %v1795_v57 = vsub.f32 %v4332_v10, %v1759_v5  ;;  %v2084_v9 = vadd.f32 %v2038_v51, %v2037_v20  ;;  %v1960_v10 = vld [vmem:[#allocation5 + $0x8] sm:$0xff] }
 0x51d   : > { %v3165_v40 = vpop.eup %3164  ;;  %3182 = vpow2.f32 %v1828_v31  ;;  %1896 = vadd.xlane.f32.xlu1 %v1895_v32  ;;  %1875 = vadd.xlane.f32.xlu0 %v1874_v16  ;;  %v1962_v32 = vld [vmem:[#allocation5 + $0x18] sm:$0xff]  ;;  %v4991_v55 = vld [vmem:[#allocation44_spill] sm:$0xff] }
 0x51e   : > { %v3167_v21 = vpop.eup %3166  ;;  %3184 = vpow2.f32 %v1858_v54  ;;  %v1854_v4 = vmul.f32 1.442695, %v1794_v53  ;;  %v1856_v59 = vmul.f32 1.442695, %v1795_v57  ;;  %v1969_v54 = vld [vmem:[#allocation5 + $0x50] sm:$0xff]  ;;  %v1964_v53 = vld [vmem:[#allocation5 + $0x28] sm:$0xff] }
 0x51f   : > { %3186 = vpow2.f32 %v1860_v63  ;;  %v1898_v11 = vadd.f32 %v3167_v21, %v3165_v40  ;;  %v3169_v24 = vpop.eup %3168  ;;  %v1966_v16 = vld [vmem:[#allocation5 + $0x38] sm:$0xff] }
 0x520   : > { %3188 = vpow2.f32 %v1854_v4  ;;  %v3171_v43 = vpop.eup %3170 }
 0x521   : > { %3190 = vpow2.f32 %v1856_v59  ;;  %v3173_v7 = vpop.eup %3172  ;;  %1899 = vadd.xlane.f32.xlu0 %v1898_v11  ;;  %v1901_v36 = vadd.f32 %v3171_v43, %v3169_v24  ;;  %v1968_v59 = vld [vmem:[#allocation5 + $0x48] sm:$0xff]  ;;  %v1970_v43 = vld [vmem:[#allocation5 + $0x58] sm:$0xff] }
 0x522   : > { %v3175_v46 = vpop.eup %3174 }
 0x523   : > { %v1877_v2 = vadd.f32 %v3175_v46, %v3173_v7 }
 0x525   : > { %v3177_v8 = vpop.eup %3176  ;;  %1878 = vadd.xlane.f32.xlu1 %v1877_v2 }
 0x526   : > { %v3179_v58 = vpop.eup %3178 }
 0x527   : > { %v1880_v62 = vadd.f32 %v3179_v58, %v3177_v8  ;;  %v1972_v8 = vld [vmem:[#allocation5 + $0x68] sm:$0xff] }
 0x529   : > { %v3181_v25 = vpop.eup %3180  ;;  %1881 = vadd.xlane.f32.xlu0 %v1880_v62  ;;  %1902 = vadd.xlane.f32.xlu1 %v1901_v36  ;;  %v4983_v62 = vsub.f32 %v4382_v14, %v4385_v18  ;;  %v4984_v36 = vsub.f32 %v4387_v19, %v4397_v33  ;;  %v4987_v14 = vsub.f32 %v4404_v39, %v4420_v48  ;;  %v1614_v39 = vld [vmem:[#allocation4 + $0x40] sm:$0xff] }
 0x52a   : > { %v3183_v22 = vpop.eup %3182  ;;  %v4988_v19 = vsub.f32 %v4422_v60, %v4436_v44  ;;  %v4990_v48 = vsub.f32 %v4441_v3, %v4455_v15  ;;  %v4994_v3 = vld [vmem:[#allocation46_spill] sm:$0xff]  ;;  %v4995_v15 = vld [vmem:[#allocation48_spill] sm:$0xff] }
 0x52b   : > { %v3185_v37 = vpop.eup %3184  ;;  %v1883_v49 = vadd.f32 %v3183_v22, %v3181_v25  ;;  %v1638_v25 = vmul.f32 1.442695, %v4983_v62  ;;  %v1656_v22 = vmul.f32 1.442695, %v4984_v36  ;;  %v1642_v18 = vmul.f32 1.442695, %v4987_v14 }
 0x52c   : > { %v3187_v26 = vpop.eup %3186  ;;  %v1658_v33 = vmul.f32 1.442695, %v4988_v19  ;;  %v1660_v13 = vmul.f32 1.442695, %v4990_v48  ;;  %v5006_v14 = vld [vmem:[#allocation55_spill] sm:$0xff] }
 0x52d   : > { %v3189_v30 = vpop.eup %3188  ;;  %1884 = vadd.xlane.f32.xlu1 %v1883_v49  ;;  %v1907_v28 = vadd.f32 %v3187_v26, %v3185_v37  ;;  %3192 = vpow2.f32 %v1638_v25  ;;  %v4985_v37 = vsub.f32 %v4389_v23, %v4400_v34  ;;  %v4986_v26 = vsub.f32 %v4402_v38, %v4417_v47  ;;  %v1615_v47 = vld [vmem:[#allocation4 + $0x48] sm:$0xff] }
 0x52e   : > { %v3191_v1 = vpop.eup %3190  ;;  %3194 = vpow2.f32 %v1656_v22  ;;  %v4989_v23 = vsub.f32 %v4424_v29, %v4439_v0  ;;  %v4992_v29 = vld [vmem:[#allocation45_spill] sm:$0xff] }
 0x52f   : > { %v1904_v52 = vadd.f32 %v3191_v1, %v3189_v30  ;;  %v1654_v49 = vmul.f32 1.442695, %v4985_v37  ;;  %v1640_v56 = vmul.f32 1.442695, %v4986_v26  ;;  %v1606_v30 = vld [vmem:[#allocation4] sm:$0xff]  ;;  %v4993_v0 = vsub.f32 %v4991_v55, %v4992_v29 }
 0x530   : > { %v1644_v34 = vmul.f32 1.442695, %v4989_v23  ;;  %v1610_v23 = vld [vmem:[#allocation4 + $0x20] sm:$0xff] }
 0x531   : > { %1905 = vadd.xlane.f32.xlu0 %v1904_v52  ;;  %1908 = vadd.xlane.f32.xlu1 %v1907_v28  ;;  %3196 = vpow2.f32 %v1654_v49  ;;  %v1646_v28 = vmul.f32 1.442695, %v4993_v0  ;;  %v1618_v0 = vld [vmem:[#allocation4 + $0x60] sm:$0xff] }
 0x532   : > { %3198 = vpow2.f32 %v1640_v56  ;;  %v1617_v56 = vld [vmem:[#allocation4 + $0x58] sm:$0xff] }
 0x533   : > { %3200 = vpow2.f32 %v1642_v18  ;;  %v5007_v18 = vld [vmem:[#allocation57_spill] sm:$0xff] }
 0x534   : > { %3202 = vpow2.f32 %v1658_v33 }
 0x535   : > { %2082 = vadd.xlane.f32.xlu0 %v2081_v6  ;;  %2085 = vadd.xlane.f32.xlu1 %v2084_v9  ;;  %3204 = vpow2.f32 %v1644_v34  ;;  %v5009_v34 = vld [vmem:[#allocation54_spill] sm:$0xff] }
 0x536   : > { %3206 = vpow2.f32 %v1660_v13 }
 0x537   : > { %3208 = vpow2.f32 %v1646_v28 }
 0x53a   : > { %v3193_v50 = vpop.eup %3192 }
 0x53b   : > { %v1670_v1 = vmul.f32 %v3193_v50, %v1606_v30  ;;  %v3195_v41 = vpop.eup %3194  ;;  %v5008_v50 = vsub.f32 %v5006_v14, %v5007_v18 }
 0x53c   : > { %v2071_v27 = vpop.xlane.xlu0 %2070  ;;  %v1679_v60 = vmul.f32 %v3195_v41, %v1615_v47 }
 0x53d   : > { %v2097_v31 = vadd.f32 %v2071_v27, %v1969_v54  ;;  %v1607_v54 = vld [vmem:[#allocation4 + $0x8] sm:$0xff]  ;;  %v1652_v30 = vmul.f32 1.442695, %v5008_v50 }
 0x53e   : > { %v3197_v52 = vpop.eup %3196 }
 0x53f   : > { %2113 = vst.msk [vmem:[#allocation5 + $0x50] sm:$0xff] %vm1926_vm1, %v2097_v31  ;;  %v1678_v20 = vmul.f32 %v3197_v52, %v1614_v39  ;;  %v3199_v6 = vpop.eup %3198  ;;  %v4996_v31 = vsub.f32 %v4994_v3, %v4995_v15  ;;  %v5012_v52 = vld [vmem:[#allocation58_spill] sm:$0xff]  ;;  %v5013_v39 = vld [vmem:[#allocation59_spill] sm:$0xff] }
 0x540   : > { %v2077_v61 = vpop.xlane.xlu0 %2076  ;;  %v5014_v48 = vsub.f32 %v5012_v52, %v5013_v39  ;;  %v1612_v3 = vld [vmem:[#allocation4 + $0x30] sm:$0xff] }
 0x541   : > { %v2099_v63 = vadd.f32 %v2077_v61, %v1971_v42  ;;  %v1662_v42 = vmul.f32 1.442695, %v4996_v31  ;;  %v1671_v61 = vmul.f32 %v3199_v6, %v1607_v54 }
 0x542   : > { %v1668_v13 = vmul.f32 1.442695, %v5014_v48 }
 0x543   : > { %2115 = vst.msk [vmem:[#allocation5 + $0x60] sm:$0xff] %vm1926_vm1, %v2099_v63  ;;  %v3201_v63 = vpop.eup %3200  ;;  %3210 = vpow2.f32 %v1662_v42 }
 0x54d   : > { %v2044_v5 = vpop.xlane.xlu1 %2043 }
 0x54e   : > { %v2088_v17 = vadd.f32 %v2044_v5, %v1960_v10  ;;  %v1608_v5 = vld [vmem:[#allocation4 + $0x10] sm:$0xff] }
 0x550   : > { %2104 = vst.msk [vmem:[#allocation5 + $0x8] sm:$0xff] %vm1926_vm1, %v2088_v17 }
 0x551   : > { %v2050_v12 = vpop.xlane.xlu1 %2049 }
 0x552   : > { %v2090_v35 = vadd.f32 %v2050_v12, %v1962_v32  ;;  %v4997_v32 = vld [vmem:[#allocation47_spill] sm:$0xff]  ;;  %v4998_v12 = vld [vmem:[#allocation49_spill] sm:$0xff] }
 0x554   : > { %2106 = vst.msk [vmem:[#allocation5 + $0x18] sm:$0xff] %vm1926_vm1, %v2090_v35  ;;  %v4999_v35 = vsub.f32 %v4997_v32, %v4998_v12 }
 0x555   : > { %v2056_v57 = vpop.xlane.xlu1 %2055 }
 0x556   : > { %v2092_v40 = vadd.f32 %v2056_v57, %v1964_v53  ;;  %v1648_v53 = vmul.f32 1.442695, %v4999_v35  ;;  %v1672_v57 = vmul.f32 %v3201_v63, %v1608_v5 }
 0x558   : > { %2108 = vst.msk [vmem:[#allocation5 + $0x28] sm:$0xff] %vm1926_vm1, %v2092_v40  ;;  %v3203_v40 = vpop.eup %3202  ;;  %3212 = vpow2.f32 %v1648_v53  ;;  %v1613_v53 = vld [vmem:[#allocation4 + $0x38] sm:$0xff] }
 0x559   : > { %v2062_v21 = vpop.xlane.xlu1 %2061 }
 0x55a   : > { %v2094_v4 = vadd.f32 %v2062_v21, %v1966_v16  ;;  %v1616_v21 = vld [vmem:[#allocation4 + $0x50] sm:$0xff] }
 0x55b   : > { %v1680_v25 = vmul.f32 %v3203_v40, %v1616_v21 }
 0x55c   : > { %2110 = vst.msk [vmem:[#allocation5 + $0x38] sm:$0xff] %vm1926_vm1, %v2094_v4  ;;  %v5000_v4 = vld [vmem:[#allocation51_spill] sm:$0xff] }
 0x55d   : > { %v2068_v11 = vpop.xlane.xlu1 %2067 }
 0x55e   : > { %v2096_v24 = vadd.f32 %v2068_v11, %v1968_v59  ;;  %v5001_v59 = vld [vmem:[#allocation53_spill] sm:$0xff] }
 0x55f   : > { %v5002_v11 = vsub.f32 %v5000_v4, %v5001_v59 }
 0x560   : > { %2112 = vst.msk [vmem:[#allocation5 + $0x48] sm:$0xff] %vm1926_vm1, %v2096_v24 }
 0x561   : > { %v2074_v7 = vpop.xlane.xlu1 %2073  ;;  %v1650_v24 = vmul.f32 1.442695, %v5002_v11  ;;  %v1621_v11 = vld [vmem:[#allocation4 + $0x78] sm:$0xff] }
 0x562   : > { %v2098_v46 = vadd.f32 %v2074_v7, %v1970_v43  ;;  %v3205_v7 = vpop.eup %3204 }
 0x563   : > { %3214 = vpow2.f32 %v1650_v24  ;;  %v3207_v49 = vpop.eup %3206 }
 0x564   : > { %2114 = vst.msk [vmem:[#allocation5 + $0x58] sm:$0xff] %vm1926_vm1, %v2098_v46  ;;  %v1609_v46 = vld [vmem:[#allocation4 + $0x18] sm:$0xff]  ;;  %v3209_v33 = vpop.eup %3208  ;;  %v1681_v47 = vmul.f32 %v3207_v49, %v1617_v56 }
 0x565   : > { %v2080_v2 = vpop.xlane.xlu1 %2079  ;;  %v1673_v37 = vmul.f32 %v3205_v7, %v1609_v46  ;;  %v3211_v55 = vpop.eup %3210 }
 0x566   : > { %v2100_v58 = vadd.f32 %v2080_v2, %v1972_v8  ;;  %v5003_v8 = vld [vmem:[#allocation50_spill] sm:$0xff]  ;;  %v5004_v2 = vld [vmem:[#allocation52_spill] sm:$0xff] }
 0x568   : > { %2116 = vst.msk [vmem:[#allocation5 + $0x68] sm:$0xff] %vm1926_vm1, %v2100_v58  ;;  %v5005_v58 = vsub.f32 %v5003_v8, %v5004_v2 }
 0x56a   : > { %v1664_v62 = vmul.f32 1.442695, %v5005_v58  ;;  %v1973_v58 = vld [vmem:[#allocation5 + $0x70] sm:$0xff] }
 0x56c   : > { %3216 = vpow2.f32 %v1664_v62 }
 0x56d   : > { %3218 = vpow2.f32 %v1652_v30 }
 0x58e   : > { %v1864_v38 = vpop.xlane.xlu1 %1863 }
 0x58f   : > { %v1910_v45 = vadd.f32 %v1864_v38, %v1670_v1  ;;  %v5010_v1 = vld [vmem:[#allocation56_spill] sm:$0xff] }
 0x590   : > { %v5011_v41 = vsub.f32 %v5009_v34, %v5010_v1 }
 0x591   : > { %1927 = vst.msk [vmem:[#allocation4] sm:$0xff] %vm1926_vm1, %v1910_v45 }
 0x592   : > { %v1891_v44 = vpop.xlane.xlu1 %1890  ;;  %v1666_v38 = vmul.f32 1.442695, %v5011_v41 }
 0x593   : > { %v1919_v51 = vadd.f32 %v1891_v44, %v1679_v60  ;;  %v1674_v60 = vmul.f32 %v3209_v33, %v1610_v23 }
 0x594   : > { %v1888_v9 = vpop.xlane.xlu0 %1887  ;;  %3220 = vpow2.f32 %v1666_v38 }
 0x595   : > { %v1918_v27 = vadd.f32 %v1888_v9, %v1678_v20  ;;  %1936 = vst.msk [vmem:[#allocation4 + $0x48] sm:$0xff] %vm1926_vm1, %v1919_v51  ;;  %3222 = vpow2.f32 %v1668_v13  ;;  %v1682_v20 = vmul.f32 %v3211_v55, %v1618_v0  ;;  %v3213_v51 = vpop.eup %3212  ;;  %v1611_v9 = vld [vmem:[#allocation4 + $0x28] sm:$0xff] }
 0x596   : > { %v1675_v15 = vmul.f32 %v3213_v51, %v1611_v9 }
 0x597   : > { %1935 = vst.msk [vmem:[#allocation4 + $0x40] sm:$0xff] %vm1926_vm1, %v1918_v27  ;;  %v3215_v27 = vpop.eup %3214 }
 0x598   : > { %v1867_v10 = vpop.xlane.xlu0 %1866  ;;  %v3217_v31 = vpop.eup %3216 }
 0x599   : > { %v1911_v17 = vadd.f32 %v1867_v10, %v1671_v61  ;;  %v1619_v61 = vld [vmem:[#allocation4 + $0x68] sm:$0xff]  ;;  %v1676_v10 = vmul.f32 %v3215_v27, %v1612_v3  ;;  %v3219_v12 = vpop.eup %3218 }
 0x59a   : > { %v1683_v32 = vmul.f32 %v3217_v31, %v1619_v61  ;;  %v1677_v21 = vmul.f32 %v3219_v12, %v1613_v53 }
 0x59b   : > { %1928 = vst.msk [vmem:[#allocation4 + $0x8] sm:$0xff] %vm1926_vm1, %v1911_v17 }
 0x59c   : > { %v1870_v16 = vpop.xlane.xlu0 %1869 }
 0x59d   : > { %v1912_v43 = vadd.f32 %v1870_v16, %v1672_v57  ;;  %v1620_v16 = vld [vmem:[#allocation4 + $0x70] sm:$0xff] }
 0x59f   : > { %1929 = vst.msk [vmem:[#allocation4 + $0x10] sm:$0xff] %vm1926_vm1, %v1912_v43 }
 0x5a0   : > { %v1894_v36 = vpop.xlane.xlu0 %1893 }
 0x5a1   : > { %v1920_v22 = vadd.f32 %v1894_v36, %v1680_v25  ;;  %v3221_v40 = vpop.eup %3220  ;;  %v1974_v36 = vld [vmem:[#allocation5 + $0x78] sm:$0xff] }
 0x5a2   : > { %v1873_v26 = vpop.xlane.xlu1 %1872  ;;  %v3223_v4 = vpop.eup %3222  ;;  %v1684_v43 = vmul.f32 %v3221_v40, %v1620_v16 }
 0x5a3   : > { %1937 = vst.msk [vmem:[#allocation4 + $0x50] sm:$0xff] %vm1926_vm1, %v1920_v22  ;;  %v1913_v19 = vadd.f32 %v1873_v26, %v1673_v37  ;;  %v1685_v8 = vmul.f32 %v3223_v4, %v1621_v11 }
 0x5a5   : > { %1930 = vst.msk [vmem:[#allocation4 + $0x18] sm:$0xff] %vm1926_vm1, %v1913_v19 }
 0x5a6   : > { %v1897_v45 = vpop.xlane.xlu1 %1896  ;;  %v1876_v29 = vpop.xlane.xlu0 %1875 }
 0x5a7   : > { %v1921_v44 = vadd.f32 %v1897_v45, %v1681_v47  ;;  %v1914_v28 = vadd.f32 %v1876_v29, %v1674_v60 }
 0x5a9   : > { %1938 = vst.msk [vmem:[#allocation4 + $0x58] sm:$0xff] %vm1926_vm1, %v1921_v44  ;;  %1931 = vst.msk [vmem:[#allocation4 + $0x20] sm:$0xff] %vm1926_vm1, %v1914_v28 }
 0x5aa   : > { %v1900_v6 = vpop.xlane.xlu0 %1899 }
 0x5ab   : > { %v1922_v54 = vadd.f32 %v1900_v6, %v1682_v20 }
 0x5ad   : > { %1939 = vst.msk [vmem:[#allocation4 + $0x60] sm:$0xff] %vm1926_vm1, %v1922_v54 }
 0x5ae   : > { %v1879_v42 = vpop.xlane.xlu1 %1878 }
 0x5af   : > { %v1915_v63 = vadd.f32 %v1879_v42, %v1675_v15 }
 0x5b1   : > { %1932 = vst.msk [vmem:[#allocation4 + $0x28] sm:$0xff] %vm1926_vm1, %v1915_v63 }
 0x5b2   : > { %v1882_v5 = vpop.xlane.xlu0 %1881  ;;  %v1903_v35 = vpop.xlane.xlu1 %1902 }
 0x5b3   : > { %v1916_v17 = vadd.f32 %v1882_v5, %v1676_v10  ;;  %v1923_v57 = vadd.f32 %v1903_v35, %v1683_v32 }
 0x5b5   : > { %1933 = vst.msk [vmem:[#allocation4 + $0x30] sm:$0xff] %vm1926_vm1, %v1916_v17  ;;  %1940 = vst.msk [vmem:[#allocation4 + $0x68] sm:$0xff] %vm1926_vm1, %v1923_v57 }
 0x5b6   : > { %v1885_v59 = vpop.xlane.xlu1 %1884 }
 0x5b7   : > { %v1917_v24 = vadd.f32 %v1885_v59, %v1677_v21 }
 0x5b9   : > { %1934 = vst.msk [vmem:[#allocation4 + $0x38] sm:$0xff] %vm1926_vm1, %v1917_v24 }
 0x5ba   : > { %v1906_v7 = vpop.xlane.xlu0 %1905  ;;  %v1909_v2 = vpop.xlane.xlu1 %1908 }
 0x5bb   : > { %v1924_v46 = vadd.f32 %v1906_v7, %v1684_v43  ;;  %v1925_v62 = vadd.f32 %v1909_v2, %v1685_v8 }
 0x5bd   : > { %1941 = vst.msk [vmem:[#allocation4 + $0x70] sm:$0xff] %vm1926_vm1, %v1924_v46  ;;  %1942 = vst.msk [vmem:[#allocation4 + $0x78] sm:$0xff] %vm1926_vm1, %v1925_v62  ;;  %2122 = sbr.rel (%p2707_p0) target bundleno = 1649 (0x671), region = 76 }
 0x5be   : > { %v2083_v25 = vpop.xlane.xlu0 %2082  ;;  %v2086_v37 = vpop.xlane.xlu1 %2085 }
 0x5bf   : > { %v2101_v22 = vadd.f32 %v2083_v25, %v1973_v58  ;;  %v2102_v49 = vadd.f32 %v2086_v37, %v1974_v36 }
 0x5c1   : > { %2117 = vst.msk [vmem:[#allocation5 + $0x70] sm:$0xff] %vm1926_vm1, %v2101_v22  ;;  %2118 = vst.msk [vmem:[#allocation5 + $0x78] sm:$0xff] %vm1926_vm1, %v2102_v49 }
 0x5c2   : > { %v2141_v26 = vld [vmem:[#allocation4 + $0x10] sm:$0xff]  ;;  %v3597_v56 = vmov 0   ;;  %v2139_v14 = vld [vmem:[#allocation4] sm:$0xff]  ;;  %v2142_v18 = vld [vmem:[#allocation4 + $0x18] sm:$0xff] }
 0x5c3   : > { %3225 = vset.pattern.permute.xlu1 %v3597_v56  ;;  %3224 = vset.pattern.permute.xlu0 %v3597_v56  ;;  %3226 = vlog2.f32 %v2141_v26  ;;  %v2140_v50 = vld [vmem:[#allocation4 + $0x8] sm:$0xff]  ;;  %v2143_v19 = vld [vmem:[#allocation4 + $0x20] sm:$0xff]  ;;  %v2146_v33 = vld [vmem:[#allocation4 + $0x38] sm:$0xff] }
 0x5c4   : > { %3228 = vlog2.f32 %v2139_v14  ;;  %v2144_v30 = vld [vmem:[#allocation4 + $0x28] sm:$0xff]  ;;  %v2145_v23 = vld [vmem:[#allocation4 + $0x30] sm:$0xff]  ;;  %v2147_v1 = vld [vmem:[#allocation4 + $0x40] sm:$0xff] }
 0x5c5   : > { %3230 = vlog2.f32 %v2142_v18  ;;  %v2148_v34 = vld [vmem:[#allocation4 + $0x48] sm:$0xff]  ;;  %v2150_v41 = vld [vmem:[#allocation4 + $0x58] sm:$0xff]  ;;  %v2149_v38 = vld [vmem:[#allocation4 + $0x50] sm:$0xff] }
 0x5c6   : > { %3232 = vlog2.f32 %v2140_v50  ;;  %v2125_v45 = vld [vmem:[#allocation3 + $0x10] sm:$0xff]  ;;  %v2152_v52 = vld [vmem:[#allocation4 + $0x68] sm:$0xff]  ;;  %v2123_v13 = vld [vmem:[#allocation3] sm:$0xff] }
 0x5c7   : > { %3234 = vlog2.f32 %v2144_v30  ;;  %v2151_v60 = vld [vmem:[#allocation4 + $0x60] sm:$0xff]  ;;  %v2205_v55 = vld [vmem:[#allocation5 + $0x10] sm:$0xff]  ;;  %v2126_v0 = vld [vmem:[#allocation3 + $0x18] sm:$0xff] }
 0x5c8   : > { %3236 = vlog2.f32 %v2143_v19  ;;  %v2203_v51 = vld [vmem:[#allocation5] sm:$0xff]  ;;  %v2124_v9 = vld [vmem:[#allocation3 + $0x8] sm:$0xff]  ;;  %v2206_v3 = vld [vmem:[#allocation5 + $0x18] sm:$0xff] }
 0x5c9   : > { %3238 = vlog2.f32 %v2146_v33  ;;  %v2128_v31 = vld [vmem:[#allocation3 + $0x28] sm:$0xff]  ;;  %v2154_v42 = vld [vmem:[#allocation4 + $0x78] sm:$0xff]  ;;  %v2127_v32 = vld [vmem:[#allocation3 + $0x20] sm:$0xff] }
 0x5ca   : > { %3240 = vlog2.f32 %v2145_v23  ;;  %v2204_v5 = vld [vmem:[#allocation5 + $0x8] sm:$0xff]  ;;  %v2153_v12 = vld [vmem:[#allocation4 + $0x70] sm:$0xff]  ;;  %v2130_v46 = vld [vmem:[#allocation3 + $0x38] sm:$0xff] }
 0x5cb   : > { %3242 = vlog2.f32 %v2148_v34  ;;  %v2208_v43 = vld [vmem:[#allocation5 + $0x28] sm:$0xff]  ;;  %v2207_v58 = vld [vmem:[#allocation5 + $0x20] sm:$0xff]  ;;  %v2129_v62 = vld [vmem:[#allocation3 + $0x30] sm:$0xff] }
 0x5cc   : > { %3244 = vlog2.f32 %v2147_v1  ;;  %v2210_v26 = vld [vmem:[#allocation5 + $0x38] sm:$0xff]  ;;  %v2132_v14 = vld [vmem:[#allocation3 + $0x48] sm:$0xff]  ;;  %v2209_v30 = vld [vmem:[#allocation5 + $0x30] sm:$0xff] }
 0x5cd   : > { %3246 = vlog2.f32 %v2150_v41  ;;  %v2131_v19 = vld [vmem:[#allocation3 + $0x40] sm:$0xff] }
 0x5ce   : > { %3248 = vlog2.f32 %v2149_v38  ;;  %v2212_v38 = vld [vmem:[#allocation5 + $0x48] sm:$0xff] }
 0x5cf   : > { %3250 = vlog2.f32 %v2152_v52 }
 0x5d0   : > { %v3227_v47 = vpop.eup %3226  ;;  %3252 = vlog2.f32 %v2151_v60 }
 0x5d1   : > { %v3229_v39 = vpop.eup %3228  ;;  %v2160_v48 = vmul.f32 0.6931472, %v3227_v47  ;;  %3254 = vlog2.f32 %v2154_v42 }
 0x5d2   : > { %v3231_v44 = vpop.eup %3230  ;;  %v2156_v29 = vmul.f32 0.6931472, %v3229_v39  ;;  %3256 = vlog2.f32 %v2153_v12 }
 0x5d3   : > { %v3233_v28 = vpop.eup %3232  ;;  %v2189_v20 = vadd.f32 %v2160_v48, %v2125_v45  ;;  %v2162_v6 = vmul.f32 0.6931472, %v3231_v44  ;;  %v2134_v45 = vld [vmem:[#allocation3 + $0x58] sm:$0xff]  ;;  %v2211_v48 = vld [vmem:[#allocation5 + $0x40] sm:$0xff] }
 0x5d4   : > { %v3235_v54 = vpop.eup %3234  ;;  %v2187_v27 = vadd.f32 %v2156_v29, %v2123_v13  ;;  %v2158_v15 = vmul.f32 0.6931472, %v3233_v28  ;;  %v2133_v13 = vld [vmem:[#allocation3 + $0x50] sm:$0xff]  ;;  %v2214_v28 = vld [vmem:[#allocation5 + $0x58] sm:$0xff] }
 0x5d5   : > { %v3237_v61 = vpop.eup %3236  ;;  %v2221_v63 = vsub.f32 %v2189_v20, %v2205_v55  ;;  %v2190_v10 = vadd.f32 %v2162_v6, %v2126_v0  ;;  %v2166_v17 = vmul.f32 0.6931472, %v3235_v54  ;;  %v2213_v54 = vld [vmem:[#allocation5 + $0x50] sm:$0xff] }
 0x5d6   : > { %v3239_v35 = vpop.eup %3238  ;;  %v2219_v53 = vsub.f32 %v2187_v27, %v2203_v51  ;;  %v2188_v57 = vadd.f32 %v2158_v15, %v2124_v9  ;;  %v2164_v40 = vmul.f32 0.6931472, %v3237_v61  ;;  %v2136_v51 = vld [vmem:[#allocation3 + $0x68] sm:$0xff]  ;;  %v2135_v27 = vld [vmem:[#allocation3 + $0x60] sm:$0xff] }
 0x5d7   : > { %v3241_v16 = vpop.eup %3240  ;;  %2247 = vperm.xlu1 %3225, %v2221_v63   ;;  %v2222_v21 = vsub.f32 %v2190_v10, %v2206_v3  ;;  %v2192_v4 = vadd.f32 %v2166_v17, %v2128_v31  ;;  %v2170_v59 = vmul.f32 0.6931472, %v3239_v35  ;;  %v2216_v61 = vld [vmem:[#allocation5 + $0x68] sm:$0xff]  ;;  %v2138_v10 = vld [vmem:[#allocation3 + $0x78] sm:$0xff]  ;;  %v2215_v17 = vld [vmem:[#allocation5 + $0x60] sm:$0xff] }
 0x5d8   : > { %v3243_v11 = vpop.eup %3242  ;;  %2237 = vperm.xlu0 %3224, %v2219_v53   ;;  %v2220_v24 = vsub.f32 %v2188_v57, %v2204_v5  ;;  %v2191_v7 = vadd.f32 %v2164_v40, %v2127_v32  ;;  %v2168_v8 = vmul.f32 0.6931472, %v3241_v16  ;;  %v2137_v32 = vld [vmem:[#allocation3 + $0x70] sm:$0xff]  ;;  %v2218_v57 = vld [vmem:[#allocation5 + $0x78] sm:$0xff] }
 0x5d9   : > { %v3245_v2 = vpop.eup %3244  ;;  %v2224_v25 = vsub.f32 %v2192_v4, %v2208_v43  ;;  %v2194_v36 = vadd.f32 %v2170_v59, %v2130_v46  ;;  %v2174_v22 = vmul.f32 0.6931472, %v3243_v11  ;;  %v2217_v16 = vld [vmem:[#allocation5 + $0x70] sm:$0xff] }
 0x5da   : > { %v3247_v37 = vpop.eup %3246  ;;  %v2223_v49 = vsub.f32 %v2191_v7, %v2207_v58  ;;  %v2193_v56 = vadd.f32 %v2168_v8, %v2129_v62  ;;  %v2172_v18 = vmul.f32 0.6931472, %v3245_v2 }
 0x5db   : > { %2252 = vperm.xlu1 %3225, %v2222_v21   ;;  %v3249_v50 = vpop.eup %3248  ;;  %v2226_v33 = vsub.f32 %v2194_v36, %v2210_v26  ;;  %v2196_v23 = vadd.f32 %v2174_v22, %v2132_v14  ;;  %v2178_v34 = vmul.f32 0.6931472, %v3247_v37 }
 0x5dc   : > { %2242 = vperm.xlu0 %3224, %v2220_v24   ;;  %v3251_v1 = vpop.eup %3250  ;;  %v2225_v41 = vsub.f32 %v2193_v56, %v2209_v30  ;;  %v2195_v47 = vadd.f32 %v2172_v18, %v2131_v19  ;;  %v2176_v52 = vmul.f32 0.6931472, %v3249_v50 }
 0x5dd   : > { %v3253_v39 = vpop.eup %3252  ;;  %v2228_v60 = vsub.f32 %v2196_v23, %v2212_v38  ;;  %v2198_v44 = vadd.f32 %v2178_v34, %v2134_v45  ;;  %v2182_v55 = vmul.f32 0.6931472, %v3251_v1 }
 0x5de   : > { %v3255_v29 = vpop.eup %3254  ;;  %v2227_v0 = vsub.f32 %v2195_v47, %v2211_v48  ;;  %v2197_v20 = vadd.f32 %v2176_v52, %v2133_v13  ;;  %v2180_v6 = vmul.f32 0.6931472, %v3253_v39 }
 0x5df   : > { %2262 = vperm.xlu1 %3225, %v2224_v25   ;;  %v3257_v9 = vpop.eup %3256  ;;  %v2230_v3 = vsub.f32 %v2198_v44, %v2214_v28  ;;  %v2200_v15 = vadd.f32 %v2182_v55, %v2136_v51  ;;  %v2186_v31 = vmul.f32 0.6931472, %v3255_v29 }
 0x5e0   : > { %2257 = vperm.xlu0 %3224, %v2223_v49   ;;  %v2229_v42 = vsub.f32 %v2197_v20, %v2213_v54  ;;  %v2199_v63 = vadd.f32 %v2180_v6, %v2135_v27  ;;  %v2184_v5 = vmul.f32 0.6931472, %v3257_v9 }
 0x5e1   : > { %v2232_v12 = vsub.f32 %v2200_v15, %v2216_v61  ;;  %v2202_v35 = vadd.f32 %v2186_v31, %v2138_v10 }
 0x5e2   : > { %v2231_v53 = vsub.f32 %v2199_v63, %v2215_v17  ;;  %v2201_v40 = vadd.f32 %v2184_v5, %v2137_v32 }
 0x5e3   : > { %2272 = vperm.xlu1 %3225, %v2226_v33   ;;  %v2234_v21 = vsub.f32 %v2202_v35, %v2218_v57 }
 0x5e4   : > { %2267 = vperm.xlu0 %3224, %v2225_v41   ;;  %v2233_v4 = vsub.f32 %v2201_v40, %v2217_v16 }
 0x5e7   : > { %2282 = vperm.xlu1 %3225, %v2228_v60  }
 0x5e8   : > { %2277 = vperm.xlu0 %3224, %v2227_v0  }
 0x5eb   : > { %2292 = vperm.xlu1 %3225, %v2230_v3  }
 0x5ec   : > { %2287 = vperm.xlu0 %3224, %v2229_v42  }
 0x5ef   : > { %2302 = vperm.xlu1 %3225, %v2232_v12  }
 0x5f0   : > { %2297 = vperm.xlu0 %3224, %v2231_v53  }
 0x5f3   : > { %2312 = vperm.xlu1 %3225, %v2234_v21  }
 0x5f4   : > { %2307 = vperm.xlu0 %3224, %v2233_v4  }
 0x652   : > { %v2248_v59 = vpop.permute.xlu1 %2247 }
 0x653   : > { %2317 = vst [vmem:[%s3969_s11 + $0x10] sm:$0xff] %v2248_v59  ;;  %v2238_v11 = vpop.permute.xlu0 %2237 }
 0x654   : > { %2315 = vst [vmem:[%s3969_s11] sm:$0xff] %v2238_v11 }
 0x656   : > { %v2253_v24 = vpop.permute.xlu1 %2252 }
 0x657   : > { %2318 = vst [vmem:[%s3969_s11 + $0x18] sm:$0xff] %v2253_v24  ;;  %v2243_v43 = vpop.permute.xlu0 %2242 }
 0x658   : > { %2316 = vst [vmem:[%s3969_s11 + $0x8] sm:$0xff] %v2243_v43 }
 0x65a   : > { %v2263_v7 = vpop.permute.xlu1 %2262 }
 0x65b   : > { %2320 = vst [vmem:[%s3969_s11 + $0x28] sm:$0xff] %v2263_v7  ;;  %v2258_v46 = vpop.permute.xlu0 %2257 }
 0x65c   : > { %2319 = vst [vmem:[%s3969_s11 + $0x20] sm:$0xff] %v2258_v46 }
 0x65e   : > { %v2273_v8 = vpop.permute.xlu1 %2272 }
 0x65f   : > { %2322 = vst [vmem:[%s3969_s11 + $0x38] sm:$0xff] %v2273_v8  ;;  %v2268_v2 = vpop.permute.xlu0 %2267 }
 0x660   : > { %2321 = vst [vmem:[%s3969_s11 + $0x30] sm:$0xff] %v2268_v2 }
 0x662   : > { %v2283_v58 = vpop.permute.xlu1 %2282 }
 0x663   : > { %2324 = vst [vmem:[%s3969_s11 + $0x48] sm:$0xff] %v2283_v58  ;;  %v2278_v62 = vpop.permute.xlu0 %2277 }
 0x664   : > { %2323 = vst [vmem:[%s3969_s11 + $0x40] sm:$0xff] %v2278_v62 }
 0x666   : > { %v2293_v25 = vpop.permute.xlu1 %2292 }
 0x667   : > { %2326 = vst [vmem:[%s3969_s11 + $0x58] sm:$0xff] %v2293_v25  ;;  %v2288_v36 = vpop.permute.xlu0 %2287 }
 0x668   : > { %2325 = vst [vmem:[%s3969_s11 + $0x50] sm:$0xff] %v2288_v36 }
 0x66a   : > { %v2303_v22 = vpop.permute.xlu1 %2302 }
 0x66b   : > { %2328 = vst [vmem:[%s3969_s11 + $0x68] sm:$0xff] %v2303_v22  ;;  %v2298_v37 = vpop.permute.xlu0 %2297 }
 0x66c   : > { %2327 = vst [vmem:[%s3969_s11 + $0x60] sm:$0xff] %v2298_v37 }
 0x66e   : > { %v2313_v49 = vpop.permute.xlu1 %2312 }
 0x66f   : > { %2330 = vst [vmem:[%s3969_s11 + $0x78] sm:$0xff] %v2313_v49  ;;  %v2308_v26 = vpop.permute.xlu0 %2307 }
 0x670   : > { %2329 = vst [vmem:[%s3969_s11 + $0x70] sm:$0xff] %v2308_v26 }
 0x671 PF: > { %s5016_s23 = sld [smem:[#allocation29_spill]]  ;;  %s2355_s27 = sshll.u32 %s3967_s5, 4  ;;  %s4718_s27 = int_to_ptr.vmem [resolvable:$true] %s2355_s27 }
 0x672   : > { %s5017_s8 = sld [smem:[#allocation30_spill]]  ;;  %s4727_s28 = scalar_lea.sflag [#allocation8], %s529_s4 }
 0x673   : > { %s5020_s2 = sld [smem:[#allocation64_spill]]  ;;  %s3398_s7 = scalar_lea.vmem %s4718_s27, 2048 }
 0x674   : > { %p3399_p4 = scmp.ne.s32.totalorder %s4718_s27, %s3398_s7  ;;  %s3598_s5 = smov [#allocation15]  }
 0x675   : > { %s3402_s19 = sshll.u32 %s3598_s5, 4  ;;  %s3403_s19 = int_to_ptr.vmem [resolvable:$false] %s3402_s19 }
 0x676   : > { %p3400_p2 = pnand %p3399_p4, %p3747_p10  ;;  %s3404_s15 = scalar_lea.vmem %s3403_s19, 4096 }
 0x677   : > { %s2710_s9 = sshll.u32 %s5016_s23, 1  ;;  %p3405_p8 = scmp.lt.s32.totalorder %s4718_s27, %s3403_s19 }
 0x678   : > { %s2711_s30 = sshll.u32 %s5017_s8, 6  ;;  %p3401_p11 = pneg %p3400_p2 }
 0x679   : > { %s2352_s26 = sadd.s32 %s2711_s30, %s2710_s9  ;;  %p3406_p9 = scmp.lt.s32.totalorder %s3404_s15, %s3398_s7 }
 0x67a   : > { %s2712_s24 = sshll.u32 %s2352_s26, 6 }
 0x67b   : > { %s4723_s25 = scalar_lea.hbm %s5020_s2, %s2712_s24  ;;  %p3407_p3 = por %p3406_p9, %p3405_p8 }
 0x67d   : > { %p3408_p5 = pnand %p3407_p3, %p3401_p11 }
 0x67f   : > { %3411 = shalt.err (!%p3408_p5)
}
 0x680   : > { %s3412_s4 = scalar_lea.hbm %s4723_s25, 2048  ;;  %s3416_s23 = scalar_lea.hbm %s5020_s2, 12288 }
 0x681   : > { %p3413_p1 = scmp.ne.s32.totalorder %s4723_s25, %s3412_s4  ;;  %p3417_p6 = scmp.lt.s32.totalorder %s4723_s25, %s5020_s2 }
 0x682   : > { %p3418_p12 = scmp.lt.s32.totalorder %s3416_s23, %s3412_s4 }
 0x683   : > { %p3414_p7 = pnand %p3413_p1, %p3747_p10 }
 0x684   : > { %p3419_p0 = por %p3418_p12, %p3417_p6 }
 0x685   : > { %p3415_p13 = pneg %p3414_p7 }
 0x687   : > { %p3420_p4 = pnand %p3419_p0, %p3415_p13 }
 0x689   : > { %3423 = shalt.err (!%p3420_p4)
}
 0x68a   : > { %s3599_s30 = smov 128   ;;  %s5021_s26 = sld [smem:[#allocation34_spill]] }
 0x68b   : > { %s3600_s24 = smov 256   ;;  %s3601_s12 = smov 8  }
 0x68c   : > { %2891 = dma.vmem_to_hbm [thread:$0]  (%p3747_p10), %s4718_s27, 2048, %s4723_s25, %s4727_s28, %s3599_s30, %s3600_s24, %s3601_s12  }
 0x68d   : > { %s2753_s20 = sshll.u32 %s5017_s8, 11  ;;  %s2373_s7 = sshll.u32 %s3969_s11, 4  ;;  %s4759_s7 = int_to_ptr.vmem [resolvable:$true] %s2373_s7 }
 0x68e   : > { %s5022_s15 = sld [smem:[#allocation65_spill]]  ;;  %s2337_s13 = scalar_lea.sflag [#allocation17], %s3924_s1 }
 0x68f   : > { %s3424_s23 = scalar_lea.vmem %s4759_s7, 2048  ;;  %s3602_s22 = smov [#allocation16]  }
 0x690   : > { %p3425_p2 = scmp.ne.s32.totalorder %s4759_s7, %s3424_s23  ;;  %p5024_p11 = scmp.ne.s32.totalorder %s5021_s26, 0 }
 0x691   : > { %s3428_s27 = sshll.u32 %s3602_s22, 4  ;;  %s3429_s27 = int_to_ptr.vmem [resolvable:$false] %s3428_s27 }
 0x692   : > { %p3426_p8 = pnand %p3425_p2, %p5024_p11  ;;  %s3430_s11 = scalar_lea.vmem %s3429_s27, 4096 }
 0x693   : > { %p3431_p10 = scmp.lt.s32.totalorder %s4759_s7, %s3429_s27  ;;  %p3432_p3 = scmp.lt.s32.totalorder %s3430_s11, %s3424_s23 }
 0x694   : > { %s5023_s4 = smov %s5022_s15  ;;  %s4757_s14 = scalar_lea.hbm %s5022_s15, %s2753_s20 }
 0x695   : > { %p3427_p9 = pneg %p3426_p8  ;;  %p3433_p5 = por %p3432_p3, %p3431_p10 }
 0x697   : > { %p3434_p1 = pnand %p3433_p5, %p3427_p9 }
 0x699   : > { %3437 = shalt.err (!%p3434_p1)
}
 0x69a   : > { %s3438_s8 = scalar_lea.hbm %s4757_s14, 2048  ;;  %s3442_s28 = scalar_lea.hbm %s5023_s4, 6144 }
 0x69b   : > { %p3439_p7 = scmp.ne.s32.totalorder %s4757_s14, %s3438_s8  ;;  %p3443_p12 = scmp.lt.s32.totalorder %s4757_s14, %s5023_s4 }
 0x69c   : > { %p3444_p0 = scmp.lt.s32.totalorder %s3442_s28, %s3438_s8 }
 0x69d   : > { %p3440_p13 = pnand %p3439_p7, %p5024_p11 }
 0x69e   : > { %p3445_p4 = por %p3444_p0, %p3443_p12 }
 0x69f   : > { %p3441_p6 = pneg %p3440_p13 }
 0x6a1   : > { %p3446_p2 = pnand %p3445_p4, %p3441_p6 }
 0x6a3   : > { %3449 = shalt.err (!%p3446_p2)
}
 0x6a4   : > { %2892 = dma.vmem_to_hbm [thread:$0]  (%p5024_p11), %s4759_s7, 2048, %s4757_s14, %s2337_s13, %s3599_s30, %s3599_s30, %s3601_s12  }
 0x6a5 PF: > { %s5025_s24 = sld [smem:[#allocation23_spill]]  ;;  %p2919_p8 = scmp.ge.s32.totalorder %s3580_s18, 2 }
 0x6a6   : > { %s5026_s20 = sld [smem:[#allocation35_spill]] }
 0x6ab   : > { %s2388_s5 = sand.u32 1, %s5025_s24  }
 0x6ac   : > { %p5027_p9 = scmp.ne.s32.totalorder %s5026_s20, 0  ;;  %s2389_s19 = scalar_lea.sflag [#allocation8], %s2388_s5 }
 0x6ae   : > { %p2912_p10 = pnand %p2919_p8, %p5027_p9 }
 0x6b0   : > { %p2913_p3 = pneg %p2912_p10 }
 0x6b2   : > { %3519 = dma.done.wait (%p2913_p3), %s2389_s19, 2048  }
 0x6b3   : > { %3521 = vsyncadd (%p2913_p3), %s2389_s19, 4294965248  ;;  %s5028_s15 = sld [smem:[#allocation26_spill]] }
 0x6b4   : > { %s5029_s26 = sld [smem:[#allocation36_spill]] }
 0x6b9   : > { %s2397_s23 = sand.u32 1, %s5028_s15  }
 0x6ba   : > { %p5030_p5 = scmp.ne.s32.totalorder %s5029_s26, 0  ;;  %s2398_s22 = scalar_lea.sflag [#allocation17], %s2397_s23 }
 0x6bc   : > { %p2915_p1 = pnand %p2919_p8, %p5030_p5 }
 0x6be   : > { %p2916_p7 = pneg %p2915_p1 }
 0x6c0   : > { %3523 = dma.done.wait (%p2916_p7), %s2398_s22, 2048  }
 0x6c1   : > { %3525 = vsyncadd (%p2916_p7), %s2398_s22, 4294965248  ;;  %s34_s18 = sadd.s32 1, %s3580_s18   ;;  %s5032_s27 = sld [smem:[#allocation24_spill]] }
 0x6c2   : > { %p4793_p11 = scmp.ge.s32.totalorder %s34_s18, 8   ;;  %s5033_s12 = sld [smem:[#allocation43_spill]] }
 0x6c3   : > { %s5034_s7 = sld [smem:[#allocation25_spill]]  ;;  %s5042_s28 = smov %s3536_s29 }
 0x6c4   : > { %s5035_s14 = sld [smem:[#allocation41_spill]]  ;;  %s5045_s9 = smov %s3548_s10 }
 0x6c5   : > { %s5036_s11 = sld [smem:[#allocation27_spill]]  ;;  %s5050_s15 = smov %s3576_s17 }
 0x6c6   : > { %s5037_s13 = sld [smem:[#allocation28_spill]] }
 0x6c7   : > { %s5038_s8 = sld [smem:[#allocation42_spill]] }
 0x6c8   : > { %s5039_s1 = sld [smem:[#allocation38_spill]]  ;;  %s5043_s29 = smov %s5033_s12 }
 0x6c9   : > { %s5040_s25 = sld [smem:[#allocation40_spill]]  ;;  %s5044_s30 = smov %s5034_s7 }
 0x6ca   : > { %s5046_s10 = smov %s5035_s14  ;;  %s5049_s14 = smov %s3572_s16 }
 0x6cb   :  { %33 = sbr.rel (!%p4793_p11) target bundleno = 23 (0x17), region = 172 }
 0x6cc   : > { %s5047_s12 = smov %s5037_s13 }
 0x6cd   : > { %s5048_s13 = smov %s5038_s8 }
 0x6ce   : > { %s5051_s16 = smov %s5039_s1 }
 0x6cf   : > { %s5052_s17 = smov %s5040_s25 }
 0x6d0   :  { %2403 = vsyncpa [#allocation7], 1 }
 0x6d1   :  { %2405 = vsyncpa [#allocation7 + $0x1], 1 }
 0x6d2   :  { %2406 = vsyncpa [#allocation10], 1 }
 0x6d3   :  { %2408 = vsyncpa [#allocation10 + $0x1], 1 }
 0x6d4   :  { %2409 = vsyncpa [#allocation13], 1 }
 0x6d5   :  { %2411 = vsyncpa [#allocation13 + $0x1], 1 }
 0x6d6   :  { %2412 = vsyncpa [#allocation8], 1 }
 0x6d7   :  { %2414 = vsyncpa [#allocation8 + $0x1], 1 }
 0x6d8   :  { %2415 = vsyncpa [#allocation17], 1 }
 0x6d9   :  { %2417 = vsyncpa [#allocation17 + $0x1], 1 }

</bundles_post_ra>
